<compile_context>
chip_gen: v6e
topology: v6e:2x2x1
jax: 0.10.0
libtpu: 0.0.40
codegen_flags: <defaults>
</compile_context>

<pallas_src>
import functools

import jax
import jax.numpy as jnp
from jax import lax
from jax.experimental import pallas as pl
from jax.experimental.pallas import tpu as pltpu

EPS = 1e-5
NEG_SLOPE = 0.01  # F.leaky_relu default
VMEM_LIMIT_BYTES = 48 * 1024 * 1024  # safe on v5e/v6e (128 MiB) and v7x (64 MiB)


def _leaky_relu(x):
    return jnp.where(x >= 0, x, NEG_SLOPE * x)


def _round_up(x, m):
    return (x + m - 1) // m * m


def _conv3x3_folded(read_tap, w_ref, m, kdepth):
    """3x3 conv on one image with kw folded into the contraction dim.

    read_tap(kh, kw) -> (ho, wo, C_in) tap values.
    w_ref: (3, 3*C_in, C_out) bf16, rows ordered kw-major / cin-minor.
    Returns f32 accumulator of shape (m, C_out), m = ho*wo.
    """
    cout = w_ref.shape[2]
    acc = jnp.zeros((m, cout), jnp.float32)
    for kh in range(3):
        taps = [read_tap(kh, kw) for kw in range(3)]
        folded = jnp.concatenate(taps, axis=-1).reshape(m, kdepth)
        acc += jnp.dot(folded.astype(jnp.bfloat16), w_ref[kh],
                       preferred_element_type=jnp.float32)
    return acc


# --------------------------- pass A: conv1 (+ shortcut conv) + stats ---------------------------
def _residual_a_kernel(x_ref, w1_ref, *args, stride, has_projection):
    if has_projection:
        ws_ref, y1_ref, ys_ref, st_ref = args
    else:
        y1_ref, st_ref = args

    _, ho, wo, cout = y1_ref.shape
    cin = x_ref.shape[3]
    m = ho * wo

    def tap1(kh, kw):
        if stride == 1:
            return x_ref[0, kh:kh + ho, kw:kw + wo, :]
        return x_ref[0, pl.ds(kh, ho, stride), pl.ds(kw, wo, stride), :]

    acc1 = _conv3x3_folded(tap1, w1_ref, m, 3 * cin)
    y1_ref[...] = acc1.reshape(1, ho, wo, cout)
    st_ref[0, 0:1, :] = jnp.sum(acc1, axis=0, keepdims=True)
    st_ref[0, 1:2, :] = jnp.sum(acc1 * acc1, axis=0, keepdims=True)

    if has_projection:
        if stride == 1:
            xs = x_ref[0, 1:1 + ho, 1:1 + wo, :]
        else:
            xs = x_ref[0, pl.ds(1, ho, stride), pl.ds(1, wo, stride), :]
        accs = jnp.dot(xs.reshape(m, cin).astype(jnp.bfloat16), ws_ref[...],
                       preferred_element_type=jnp.float32)
        ys_ref[...] = accs.reshape(1, ho, wo, cout)
        st_ref[0, 2:3, :] = jnp.sum(accs, axis=0, keepdims=True)
        st_ref[0, 3:4, :] = jnp.sum(accs * accs, axis=0, keepdims=True)


# --------------------------- pass B: BN1 + leaky_relu + conv2 + stats ---------------------------
def _residual_b_kernel(y1_ref, aff1_ref, w2_ref, y2_ref, st_ref, pad_ref):
    _, ho, wo, cout = y2_ref.shape
    m = ho * wo
    wpad = pad_ref.shape[1]

    # BN1 affine + leaky_relu (stats were made global in the wrapper).
    a1 = y1_ref[...].reshape(m, cout) * aff1_ref[0:1, :] + aff1_ref[1:2, :]
    a1 = _leaky_relu(a1)

    # Zero only the halo of the conv2 pad scratch (interior is fully overwritten).
    # Interior lives at rows [1, ho], cols [8, 8+wo); reads touch cols [7, wo+8].
    pad_ref[0:1, :, :] = jnp.zeros((1, wpad, cout), jnp.float32)
    pad_ref[ho + 1:ho + 2, :, :] = jnp.zeros((1, wpad, cout), jnp.float32)
    pad_ref[1:ho + 1, 0:8, :] = jnp.zeros((ho, 8, cout), jnp.float32)
    pad_ref[1:ho + 1, 8 + wo:wpad, :] = jnp.zeros((ho, wpad - 8 - wo, cout), jnp.float32)
    pad_ref[1:ho + 1, 8:8 + wo, :] = a1.reshape(ho, wo, cout)

    def tap2(kh, kw):
        return pad_ref[kh:kh + ho, 7 + kw:7 + kw + wo, :]

    acc2 = _conv3x3_folded(tap2, w2_ref, m, 3 * cout)
    y2_ref[...] = acc2.reshape(1, ho, wo, cout)
    st_ref[0, 0:1, :] = jnp.sum(acc2, axis=0, keepdims=True)
    st_ref[0, 1:2, :] = jnp.sum(acc2 * acc2, axis=0, keepdims=True)


# --------------------------- pass C: BN2 + shortcut-BN + add + leaky_relu ---------------------------
def _residual_c_kernel(y2_ref, ys_ref, aff_ref, o_ref):
    _, ho, wo, cout = o_ref.shape
    m = ho * wo
    y2 = y2_ref[...].reshape(m, cout)
    ys = ys_ref[...].reshape(m, cout).astype(jnp.float32)
    out = (y2 * aff_ref[0:1, :] + aff_ref[1:2, :]
           + ys * aff_ref[2:3, :] + aff_ref[3:4, :])
    o_ref[...] = _leaky_relu(out).reshape(1, ho, wo, cout).astype(o_ref.dtype)


# ----------------------------------------- wrapper -----------------------------------------
def residual_block(x_nchw, params, stride=1):
    """Pallas ResidualBlock forward. x_nchw: (N, Cin, H, W) float32, returns (N, Cout, Ho, Wo)."""
    n, cin, h, w = x_nchw.shape
    cout = params["w1"].shape[0]
    ho = (h + 2 - 3) // stride + 1
    wo = (w + 2 - 3) // stride + 1
    has_projection = (stride != 1) or (cin != cout)
    if not has_projection:
        assert stride == 1 and cin == cout, "identity shortcut requires stride==1 and cin==cout"

    f32, bf16 = jnp.float32, jnp.bfloat16
    m_total = n * ho * wo

    # ---- glue: layout conversion + padding + weight re-layout ----
    x_nhwc = jnp.transpose(x_nchw, (0, 2, 3, 1)).astype(f32)            # NHWC
    xpad = jnp.pad(x_nhwc, ((0, 0), (1, 1), (1, 1), (0, 0)))            # padding=1
    # OIHW -> HWIO -> (3, 3*Cin, Cout) with K ordered kw-major / cin-minor.
    w1 = jnp.transpose(params["w1"], (2, 3, 1, 0)).reshape(3, 3 * cin, cout).astype(bf16)
    w2 = jnp.transpose(params["w2"], (2, 3, 1, 0)).reshape(3, 3 * cout, cout).astype(bf16)
    # conv biases b1/b2 are intentionally unused: they cancel under training-mode BN.

    sem_par = pltpu.CompilerParams(dimension_semantics=("parallel",),
                                   vmem_limit_bytes=VMEM_LIMIT_BYTES)

    def img_spec(hh, ww, cc):
        return pl.BlockSpec((1, hh, ww, cc), lambda b: (b, 0, 0, 0))

    def full_spec(shape):
        return pl.BlockSpec(shape, lambda b: (0,) * len(shape))

    # -------------------- pass A --------------------
    nst = 4 if has_projection else 2
    a_inputs = [xpad, w1]
    a_in_specs = [pl.BlockSpec((1, h + 2, w + 2, cin), lambda b: (b, 0, 0, 0)),
                  full_spec((3, 3 * cin, cout))]
    a_out_shape = [jax.ShapeDtypeStruct((n, ho, wo, cout), f32)]
    a_out_specs = [img_spec(ho, wo, cout)]
    if has_projection:
        ws = jnp.transpose(params["ws"], (2, 3, 1, 0)).reshape(cin, cout).astype(bf16)
        a_inputs.append(ws)
        a_in_specs.append(full_spec((cin, cout)))
        a_out_shape.append(jax.ShapeDtypeStruct((n, ho, wo, cout), f32))
        a_out_specs.append(img_spec(ho, wo, cout))
    a_out_shape.append(jax.ShapeDtypeStruct((n, nst, cout), f32))
    a_out_specs.append(pl.BlockSpec((1, nst, cout), lambda b: (b, 0, 0)))

    flops_a = 2 * m_total * (9 * cin) * cout \
        + (2 * m_total * cin * cout if has_projection else 0)
    bytes_a = xpad.size * 4 + w1.size * 2 \
        + m_total * cout * 4 * (2 if has_projection else 1)

    a_outs = pl.pallas_call(
        functools.partial(_residual_a_kernel, stride=stride, has_projection=has_projection),
        grid=(n,),
        in_specs=tuple(a_in_specs),
        out_specs=tuple(a_out_specs),
        out_shape=tuple(a_out_shape),
        compiler_params=sem_par,
        cost_estimate=pl.CostEstimate(flops=flops_a, transcendentals=0,
                                      bytes_accessed=bytes_a),
    )(*a_inputs)

    if has_projection:
        y1, ys, st1 = a_outs
    else:
        y1, st1 = a_outs
        ys = x_nhwc  # identity shortcut

    # ---- glue: global BN statistics -> affine (scale, shift) ----
    st1_sum = jnp.sum(st1, axis=0)  # (nst, cout)

    def _affine(s, q, gamma, beta):
        mean = s / m_total
        var = jnp.maximum(q / m_total - mean * mean, 0.0)  # biased batch variance
        scale = gamma.astype(f32) * lax.rsqrt(var + EPS)
        return scale, beta.astype(f32) - mean * scale

    sc1, sh1 = _affine(st1_sum[0], st1_sum[1], params["g1"], params["bt1"])
    aff1 = jnp.stack([sc1, sh1], axis=0)  # (2, cout)

    # -------------------- pass B --------------------
    wpad = _round_up(wo + 9, 8)  # minimal aligned scratch width (reads need cols 7..wo+8)
    flops_b = 2 * m_total * (9 * cout) * cout
    bytes_b = 2 * m_total * cout * 4 + w2.size * 2

    y2, st2 = pl.pallas_call(
        _residual_b_kernel,
        grid=(n,),
        in_specs=(img_spec(ho, wo, cout), full_spec((2, cout)),
                  full_spec((3, 3 * cout, cout))),
        out_specs=(img_spec(ho, wo, cout), pl.BlockSpec((1, 2, cout), lambda b: (b, 0, 0))),
        out_shape=(jax.ShapeDtypeStruct((n, ho, wo, cout), f32),
                   jax.ShapeDtypeStruct((n, 2, cout), f32)),
        scratch_shapes=[pltpu.VMEM((ho + 2, wpad, cout), f32)],
        compiler_params=sem_par,
        cost_estimate=pl.CostEstimate(flops=flops_b, transcendentals=0,
                                      bytes_accessed=bytes_b),
    )(y1, aff1, w2)

    st2_sum = jnp.sum(st2, axis=0)
    sc2, sh2 = _affine(st2_sum[0], st2_sum[1], params["g2"], params["bt2"])
    if has_projection:
        scs, shs = _affine(st1_sum[2], st1_sum[3], params["gs"], params["bts"])
    else:
        scs = jnp.ones((cout,), f32)
        shs = jnp.zeros((cout,), f32)
    aff2 = jnp.stack([sc2, sh2, scs, shs], axis=0)  # (4, cout)

    # -------------------- pass C --------------------
    flops_c = 6 * m_total * cout
    bytes_c = 3 * m_total * cout * 4
    out_nhwc = pl.pallas_call(
        _residual_c_kernel,
        grid=(n,),
        in_specs=(img_spec(ho, wo, cout), img_spec(ho, wo, cout), full_spec((4, cout))),
        out_specs=img_spec(ho, wo, cout),
        out_shape=jax.ShapeDtypeStruct((n, ho, wo, cout), f32),
        compiler_params=sem_par,
        cost_estimate=pl.CostEstimate(flops=flops_c, transcendentals=0,
                                      bytes_accessed=bytes_c),
    )(y2, ys, aff2)

    return jnp.transpose(out_nhwc, (0, 3, 1, 2))  # back to NCHW


# --------------------- pure-JAX reference for verification ---------------------
def _ref_residual_block(x_nchw, p, stride, has_projection):
    f32 = jnp.float32
    x = jnp.transpose(x_nchw, (0, 2, 3, 1)).astype(f32)

    def conv(inp, w_oihw, s, pad):
        # Match kernel precision: bf16 operands, f32 accumulation.
        w = jnp.transpose(w_oihw, (2, 3, 1, 0))
        return lax.conv_general_dilated(
            inp.astype(jnp.bfloat16).astype(f32),
            w.astype(jnp.bfloat16).astype(f32),
            (s, s), [(pad, pad), (pad, pad)],
            dimension_numbers=("NHWC", "HWIO", "NHWC"),
            precision=lax.Precision.HIGHEST)

    def bn(y, g, b):
        mean = jnp.mean(y, axis=(0, 1, 2), keepdims=True)
        var = jnp.mean((y - mean) ** 2, axis=(0, 1, 2), keepdims=True)
        return (y - mean) * lax.rsqrt(var + EPS) * g + b

    lrelu = lambda y: jnp.where(y >= 0, y, NEG_SLOPE * y)

    out = lrelu(bn(conv(x, p["w1"], stride, 1) + p["b1"], p["g1"], p["bt1"]))
    out = bn(conv(out, p["w2"], 1, 1) + p["b2"], p["g2"], p["bt2"])
    sc = bn(conv(x, p["ws"], stride, 0), p["gs"], p["bts"]) if has_projection else x
    out = lrelu(out + sc)
    return jnp.transpose(out, (0, 3, 1, 2))


if __name__ == "__main__":
    def make_params(cin, cout, key):
        keys = jax.random.split(key, 11)
        return {
            "w1": 0.2 * jax.random.normal(keys[0], (cout, cin, 3, 3), jnp.float32),
            "b1": 0.1 * jax.random.normal(keys[1], (cout,), jnp.float32),
            "g1": 1.0 + 0.1 * jax.random.normal(keys[2], (cout,), jnp.float32),
            "bt1": 0.1 * jax.random.normal(keys[3], (cout,), jnp.float32),
            "w2": 0.2 * jax.random.normal(keys[4], (cout, cout, 3, 3), jnp.float32),
            "b2": 0.1 * jax.random.normal(keys[5], (cout,), jnp.float32),
            "g2": 1.0 + 0.1 * jax.random.normal(keys[6], (cout,), jnp.float32),
            "bt2": 0.1 * jax.random.normal(keys[7], (cout,), jnp.float32),
            "ws": 0.2 * jax.random.normal(keys[8], (cout, cin, 1, 1), jnp.float32),
            "gs": 1.0 + 0.1 * jax.random.normal(keys[9], (cout,), jnp.float32),
            "bts": 0.1 * jax.random.normal(keys[10], (cout,), jnp.float32),
        }

    def run_case(name, n, cin, cout, h, w, stride, key):
        kp, kx = jax.random.split(key)
        params = make_params(cin, cout, kp)
        x = jax.random.normal(kx, (n, cin, h, w), jnp.float32)
        out = jax.block_until_ready(residual_block(x, params, stride=stride))
        has_proj = (stride != 1) or (cin != cout)
        ref = _ref_residual_block(x, params, stride, has_proj)
        assert out.shape == ref.shape, (name, out.shape, ref.shape)
        if not jnp.allclose(out, ref, atol=1e-2, rtol=1e-2):
            raise AssertionError(
                f"{name}: mismatch, max abs err={float(jnp.max(jnp.abs(out - ref)))}")

    key = jax.random.PRNGKey(0)
    k1, k2 = jax.random.split(key)
    run_case("projection_shortcut", 2, 4, 8, 16, 16, 1, k1)   # Cin != Cout -> 1x1 conv + BN shortcut
    run_case("identity_shortcut", 2, 8, 8, 16, 16, 1, k2)     # Cin == Cout, stride 1 -> identity
    print("KERNEL_OK")
</pallas_src>

<mosaic_0001>
module attributes {stable_mosaic.version = 11 : i64} {
  func.func @_residual_a_kernel(%arg0: i32, %arg1: memref<1x18x18x4xf32, #tpu.memory_space<vmem>>, %arg2: memref<3x12x8xbf16, #tpu.memory_space<vmem>>, %arg3: memref<4x8xbf16, #tpu.memory_space<vmem>>, %arg4: memref<1x16x16x8xf32, #tpu.memory_space<vmem>>, %arg5: memref<1x16x16x8xf32, #tpu.memory_space<vmem>>, %arg6: memref<1x4x8xf32, #tpu.memory_space<vmem>>) attributes {dimension_semantics = [#tpu.dimension_semantics<parallel>], iteration_bounds = array<i64: 2>, scalar_prefetch = 0 : i64, scratch_operands = 0 : i64, tpu.core_type = #tpu.core_type<tc>, window_params = [{transform_indices = @transform_0, window_bounds = array<i64: 1, 18, 18, 4>}, {pipeline_mode = #tpu.pipeline_mode<synchronous>, transform_indices = @transform_1, window_bounds = array<i64: 3, 12, 8>}, {pipeline_mode = #tpu.pipeline_mode<synchronous>, transform_indices = @transform_2, window_bounds = array<i64: 4, 8>}, {transform_indices = @transform_3, window_bounds = array<i64: 1, 16, 16, 8>}, {transform_indices = @transform_4, window_bounds = array<i64: 1, 16, 16, 8>}, {transform_indices = @transform_5, window_bounds = array<i64: 1, 4, 8>}]} {
    %cst = arith.constant 0.000000e+00 : f32
    %0 = vector.broadcast %cst : f32 to vector<256x8xf32>
    %c0 = arith.constant 0 : index
    %c0_0 = arith.constant 0 : index
    %c0_1 = arith.constant 0 : index
    %c0_2 = arith.constant 0 : index
    %1 = vector.load %arg1[%c0, %c0_0, %c0_1, %c0_2] : memref<1x18x18x4xf32, #tpu.memory_space<vmem>>, vector<1x16x16x4xf32>
    %2 = vector.shape_cast %1 : vector<1x16x16x4xf32> to vector<16x16x4xf32>
    %c0_3 = arith.constant 0 : index
    %c0_4 = arith.constant 0 : index
    %c1 = arith.constant 1 : index
    %c0_5 = arith.constant 0 : index
    %3 = vector.load %arg1[%c0_3, %c0_4, %c1, %c0_5] : memref<1x18x18x4xf32, #tpu.memory_space<vmem>>, vector<1x16x16x4xf32>
    %4 = vector.shape_cast %3 : vector<1x16x16x4xf32> to vector<16x16x4xf32>
    %c0_6 = arith.constant 0 : index
    %c0_7 = arith.constant 0 : index
    %c2 = arith.constant 2 : index
    %c0_8 = arith.constant 0 : index
    %5 = vector.load %arg1[%c0_6, %c0_7, %c2, %c0_8] : memref<1x18x18x4xf32, #tpu.memory_space<vmem>>, vector<1x16x16x4xf32>
    %6 = vector.shape_cast %5 : vector<1x16x16x4xf32> to vector<16x16x4xf32>
    %7 = tpu.concatenate %2, %4, %6 in 2 : vector<16x16x4xf32>, vector<16x16x4xf32>, vector<16x16x4xf32> -> vector<16x16x12xf32>
    %8 = vector.shape_cast %7 : vector<16x16x12xf32> to vector<256x12xf32>
    %9 = arith.truncf %8 : vector<256x12xf32> to vector<256x12xbf16>
    %c0_9 = arith.constant 0 : index
    %c0_10 = arith.constant 0 : index
    %c0_11 = arith.constant 0 : index
    %10 = vector.load %arg2[%c0_9, %c0_10, %c0_11] : memref<3x12x8xbf16, #tpu.memory_space<vmem>>, vector<1x12x8xbf16>
    %11 = vector.shape_cast %10 : vector<1x12x8xbf16> to vector<12x8xbf16>
    %cst_12 = arith.constant dense<0.000000e+00> : vector<256x8xf32>
    %12 = tpu.matmul %9, %11, %cst_12 {dimension_numbers = #tpu.dot_dimension_numbers<[1], [0], [0], [1], [0, 0, 1, 1], [], []>} : vector<256x12xbf16>, vector<12x8xbf16>, vector<256x8xf32> -> vector<256x8xf32>
    %13 = arith.addf %0, %12 : vector<256x8xf32>
    %c0_13 = arith.constant 0 : index
    %c1_14 = arith.constant 1 : index
    %c0_15 = arith.constant 0 : index
    %c0_16 = arith.constant 0 : index
    %14 = vector.load %arg1[%c0_13, %c1_14, %c0_15, %c0_16] : memref<1x18x18x4xf32, #tpu.memory_space<vmem>>, vector<1x16x16x4xf32>
    %15 = vector.shape_cast %14 : vector<1x16x16x4xf32> to vector<16x16x4xf32>
    %c0_17 = arith.constant 0 : index
    %c1_18 = arith.constant 1 : index
    %c1_19 = arith.constant 1 : index
    %c0_20 = arith.constant 0 : index
    %16 = vector.load %arg1[%c0_17, %c1_18, %c1_19, %c0_20] : memref<1x18x18x4xf32, #tpu.memory_space<vmem>>, vector<1x16x16x4xf32>
    %17 = vector.shape_cast %16 : vector<1x16x16x4xf32> to vector<16x16x4xf32>
    %c0_21 = arith.constant 0 : index
    %c1_22 = arith.constant 1 : index
    %c2_23 = arith.constant 2 : index
    %c0_24 = arith.constant 0 : index
    %18 = vector.load %arg1[%c0_21, %c1_22, %c2_23, %c0_24] : memref<1x18x18x4xf32, #tpu.memory_space<vmem>>, vector<1x16x16x4xf32>
    %19 = vector.shape_cast %18 : vector<1x16x16x4xf32> to vector<16x16x4xf32>
    %20 = tpu.concatenate %15, %17, %19 in 2 : vector<16x16x4xf32>, vector<16x16x4xf32>, vector<16x16x4xf32> -> vector<16x16x12xf32>
    %21 = vector.shape_cast %20 : vector<16x16x12xf32> to vector<256x12xf32>
    %22 = arith.truncf %21 : vector<256x12xf32> to vector<256x12xbf16>
    %c1_25 = arith.constant 1 : index
    %c0_26 = arith.constant 0 : index
    %c0_27 = arith.constant 0 : index
    %23 = vector.load %arg2[%c1_25, %c0_26, %c0_27] : memref<3x12x8xbf16, #tpu.memory_space<vmem>>, vector<1x12x8xbf16>
    %24 = vector.shape_cast %23 : vector<1x12x8xbf16> to vector<12x8xbf16>
    %cst_28 = arith.constant dense<0.000000e+00> : vector<256x8xf32>
    %25 = tpu.matmul %22, %24, %cst_28 {dimension_numbers = #tpu.dot_dimension_numbers<[1], [0], [0], [1], [0, 0, 1, 1], [], []>} : vector<256x12xbf16>, vector<12x8xbf16>, vector<256x8xf32> -> vector<256x8xf32>
    %26 = arith.addf %13, %25 : vector<256x8xf32>
    %c0_29 = arith.constant 0 : index
    %c2_30 = arith.constant 2 : index
    %c0_31 = arith.constant 0 : index
    %c0_32 = arith.constant 0 : index
    %27 = vector.load %arg1[%c0_29, %c2_30, %c0_31, %c0_32] : memref<1x18x18x4xf32, #tpu.memory_space<vmem>>, vector<1x16x16x4xf32>
    %28 = vector.shape_cast %27 : vector<1x16x16x4xf32> to vector<16x16x4xf32>
    %c0_33 = arith.constant 0 : index
    %c2_34 = arith.constant 2 : index
    %c1_35 = arith.constant 1 : index
    %c0_36 = arith.constant 0 : index
    %29 = vector.load %arg1[%c0_33, %c2_34, %c1_35, %c0_36] : memref<1x18x18x4xf32, #tpu.memory_space<vmem>>, vector<1x16x16x4xf32>
    %30 = vector.shape_cast %29 : vector<1x16x16x4xf32> to vector<16x16x4xf32>
    %c0_37 = arith.constant 0 : index
    %c2_38 = arith.constant 2 : index
    %c2_39 = arith.constant 2 : index
    %c0_40 = arith.constant 0 : index
    %31 = vector.load %arg1[%c0_37, %c2_38, %c2_39, %c0_40] : memref<1x18x18x4xf32, #tpu.memory_space<vmem>>, vector<1x16x16x4xf32>
    %32 = vector.shape_cast %31 : vector<1x16x16x4xf32> to vector<16x16x4xf32>
    %33 = tpu.concatenate %28, %30, %32 in 2 : vector<16x16x4xf32>, vector<16x16x4xf32>, vector<16x16x4xf32> -> vector<16x16x12xf32>
    %34 = vector.shape_cast %33 : vector<16x16x12xf32> to vector<256x12xf32>
    %35 = arith.truncf %34 : vector<256x12xf32> to vector<256x12xbf16>
    %c2_41 = arith.constant 2 : index
    %c0_42 = arith.constant 0 : index
    %c0_43 = arith.constant 0 : index
    %36 = vector.load %arg2[%c2_41, %c0_42, %c0_43] : memref<3x12x8xbf16, #tpu.memory_space<vmem>>, vector<1x12x8xbf16>
    %37 = vector.shape_cast %36 : vector<1x12x8xbf16> to vector<12x8xbf16>
    %cst_44 = arith.constant dense<0.000000e+00> : vector<256x8xf32>
    %38 = tpu.matmul %35, %37, %cst_44 {dimension_numbers = #tpu.dot_dimension_numbers<[1], [0], [0], [1], [0, 0, 1, 1], [], []>} : vector<256x12xbf16>, vector<12x8xbf16>, vector<256x8xf32> -> vector<256x8xf32>
    %39 = arith.addf %26, %38 : vector<256x8xf32>
    %40 = vector.shape_cast %39 : vector<256x8xf32> to vector<1x16x16x8xf32>
    %c0_45 = arith.constant 0 : index
    %c0_46 = arith.constant 0 : index
    %c0_47 = arith.constant 0 : index
    %c0_48 = arith.constant 0 : index
    %41 = vector.load %arg4[%c0_45, %c0_46, %c0_47, %c0_48] : memref<1x16x16x8xf32, #tpu.memory_space<vmem>>, vector<1x16x16x8xf32>
    tpu.vector_store %arg4[%c0_45, %c0_46, %c0_47, %c0_48], %40 {strides = array<i32>} : memref<1x16x16x8xf32, #tpu.memory_space<vmem>>, vector<1x16x16x8xf32>,
    %cst_49 = arith.constant dense<0.000000e+00> : vector<8xf32>
    %42 = vector.multi_reduction <add>, %39, %cst_49 [0] : vector<256x8xf32> to vector<8xf32>
    %43 = vector.shape_cast %42 : vector<8xf32> to vector<1x8xf32>
    %c0_50 = arith.constant 0 : index
    %c0_51 = arith.constant 0 : index
    %c0_52 = arith.constant 0 : index
    %44 = vector.load %arg6[%c0_50, %c0_51, %c0_52] : memref<1x4x8xf32, #tpu.memory_space<vmem>>, vector<1x1x8xf32>
    %45 = vector.shape_cast %44 : vector<1x1x8xf32> to vector<1x8xf32>
    %46 = vector.shape_cast %43 : vector<1x8xf32> to vector<1x1x8xf32>
    tpu.vector_store %arg6[%c0_50, %c0_51, %c0_52], %46 {strides = array<i32>} : memref<1x4x8xf32, #tpu.memory_space<vmem>>, vector<1x1x8xf32>,
    %47 = arith.mulf %39, %39 : vector<256x8xf32>
    %cst_53 = arith.constant dense<0.000000e+00> : vector<8xf32>
    %48 = vector.multi_reduction <add>, %47, %cst_53 [0] : vector<256x8xf32> to vector<8xf32>
    %49 = vector.shape_cast %48 : vector<8xf32> to vector<1x8xf32>
    %c0_54 = arith.constant 0 : index
    %c1_55 = arith.constant 1 : index
    %c0_56 = arith.constant 0 : index
    %50 = vector.load %arg6[%c0_54, %c1_55, %c0_56] : memref<1x4x8xf32, #tpu.memory_space<vmem>>, vector<1x1x8xf32>
    %51 = vector.shape_cast %50 : vector<1x1x8xf32> to vector<1x8xf32>
    %52 = vector.shape_cast %49 : vector<1x8xf32> to vector<1x1x8xf32>
    tpu.vector_store %arg6[%c0_54, %c1_55, %c0_56], %52 {strides = array<i32>} : memref<1x4x8xf32, #tpu.memory_space<vmem>>, vector<1x1x8xf32>,
    %c0_57 = arith.constant 0 : index
    %c1_58 = arith.constant 1 : index
    %c1_59 = arith.constant 1 : index
    %c0_60 = arith.constant 0 : index
    %53 = vector.load %arg1[%c0_57, %c1_58, %c1_59, %c0_60] : memref<1x18x18x4xf32, #tpu.memory_space<vmem>>, vector<1x16x16x4xf32>
    %54 = vector.shape_cast %53 : vector<1x16x16x4xf32> to vector<16x16x4xf32>
    %55 = vector.shape_cast %54 : vector<16x16x4xf32> to vector<256x4xf32>
    %56 = arith.truncf %55 : vector<256x4xf32> to vector<256x4xbf16>
    %c0_61 = arith.constant 0 : index
    %c0_62 = arith.constant 0 : index
    %57 = vector.load %arg3[%c0_61, %c0_62] : memref<4x8xbf16, #tpu.memory_space<vmem>>, vector<4x8xbf16>
    %cst_63 = arith.constant dense<0.000000e+00> : vector<256x8xf32>
    %58 = tpu.matmul %56, %57, %cst_63 {dimension_numbers = #tpu.dot_dimension_numbers<[1], [0], [0], [1], [0, 0, 1, 1], [], []>} : vector<256x4xbf16>, vector<4x8xbf16>, vector<256x8xf32> -> vector<256x8xf32>
    %59 = vector.shape_cast %58 : vector<256x8xf32> to vector<1x16x16x8xf32>
    %c0_64 = arith.constant 0 : index
    %c0_65 = arith.constant 0 : index
    %c0_66 = arith.constant 0 : index
    %c0_67 = arith.constant 0 : index
    %60 = vector.load %arg5[%c0_64, %c0_65, %c0_66, %c0_67] : memref<1x16x16x8xf32, #tpu.memory_space<vmem>>, vector<1x16x16x8xf32>
    tpu.vector_store %arg5[%c0_64, %c0_65, %c0_66, %c0_67], %59 {strides = array<i32>} : memref<1x16x16x8xf32, #tpu.memory_space<vmem>>, vector<1x16x16x8xf32>,
    %cst_68 = arith.constant dense<0.000000e+00> : vector<8xf32>
    %61 = vector.multi_reduction <add>, %58, %cst_68 [0] : vector<256x8xf32> to vector<8xf32>
    %62 = vector.shape_cast %61 : vector<8xf32> to vector<1x8xf32>
    %c0_69 = arith.constant 0 : index
    %c2_70 = arith.constant 2 : index
    %c0_71 = arith.constant 0 : index
    %63 = vector.load %arg6[%c0_69, %c2_70, %c0_71] : memref<1x4x8xf32, #tpu.memory_space<vmem>>, vector<1x1x8xf32>
    %64 = vector.shape_cast %63 : vector<1x1x8xf32> to vector<1x8xf32>
    %65 = vector.shape_cast %62 : vector<1x8xf32> to vector<1x1x8xf32>
    tpu.vector_store %arg6[%c0_69, %c2_70, %c0_71], %65 {strides = array<i32>} : memref<1x4x8xf32, #tpu.memory_space<vmem>>, vector<1x1x8xf32>,
    %66 = arith.mulf %58, %58 : vector<256x8xf32>
    %cst_72 = arith.constant dense<0.000000e+00> : vector<8xf32>
    %67 = vector.multi_reduction <add>, %66, %cst_72 [0] : vector<256x8xf32> to vector<8xf32>
    %68 = vector.shape_cast %67 : vector<8xf32> to vector<1x8xf32>
    %c0_73 = arith.constant 0 : index
    %c3 = arith.constant 3 : index
    %c0_74 = arith.constant 0 : index
    %69 = vector.load %arg6[%c0_73, %c3, %c0_74] : memref<1x4x8xf32, #tpu.memory_space<vmem>>, vector<1x1x8xf32>
    %70 = vector.shape_cast %69 : vector<1x1x8xf32> to vector<1x8xf32>
    %71 = vector.shape_cast %68 : vector<1x8xf32> to vector<1x1x8xf32>
    tpu.vector_store %arg6[%c0_73, %c3, %c0_74], %71 {strides = array<i32>} : memref<1x4x8xf32, #tpu.memory_space<vmem>>, vector<1x1x8xf32>,
    return
  }
  func.func @transform_0(%arg0: i32) -> (i32, i32, i32, i32) {
    %c0_i32 = arith.constant 0 : i32
    %c0_i32_0 = arith.constant 0 : i32
    %c0_i32_1 = arith.constant 0 : i32
    %c0_i32_2 = arith.constant 0 : i32
    return %arg0, %c0_i32, %c0_i32_0, %c0_i32_1 : i32, i32, i32, i32
  }
  func.func @transform_1(%arg0: i32) -> (i32, i32, i32) {
    %c0_i32 = arith.constant 0 : i32
    %c0_i32_0 = arith.constant 0 : i32
    %c0_i32_1 = arith.constant 0 : i32
    %c0_i32_2 = arith.constant 0 : i32
    return %c0_i32, %c0_i32_0, %c0_i32_1 : i32, i32, i32
  }
  func.func @transform_2(%arg0: i32) -> (i32, i32) {
    %c0_i32 = arith.constant 0 : i32
    %c0_i32_0 = arith.constant 0 : i32
    %c0_i32_1 = arith.constant 0 : i32
    return %c0_i32, %c0_i32_0 : i32, i32
  }
  func.func @transform_3(%arg0: i32) -> (i32, i32, i32, i32) {
    %c0_i32 = arith.constant 0 : i32
    %c0_i32_0 = arith.constant 0 : i32
    %c0_i32_1 = arith.constant 0 : i32
    %c0_i32_2 = arith.constant 0 : i32
    return %arg0, %c0_i32, %c0_i32_0, %c0_i32_1 : i32, i32, i32, i32
  }
  func.func @transform_4(%arg0: i32) -> (i32, i32, i32, i32) {
    %c0_i32 = arith.constant 0 : i32
    %c0_i32_0 = arith.constant 0 : i32
    %c0_i32_1 = arith.constant 0 : i32
    %c0_i32_2 = arith.constant 0 : i32
    return %arg0, %c0_i32, %c0_i32_0, %c0_i32_1 : i32, i32, i32, i32
  }
  func.func @transform_5(%arg0: i32) -> (i32, i32, i32) {
    %c0_i32 = arith.constant 0 : i32
    %c0_i32_0 = arith.constant 0 : i32
    %c0_i32_1 = arith.constant 0 : i32
    return %arg0, %c0_i32, %c0_i32_0 : i32, i32, i32
  }
}

</mosaic_0001>

<bundles_post_ra>
// kernel: tpu_custom_call.1
= control target key start
LH: loop header
LB: loop body
LE: loop exit
PB: predicated region body
PF: predicated region fallthrough
CT: control target
= control target key end

     0   :  { %11 = vsyncpa [#allocation3], 0  ;;  %s5615_s0 = inlined_call_operand.vmem [shape: f32[2,18,18,4], index: 0, kind: input, shape index: {}]   ;;  %s5616_s1 = inlined_call_operand.vmem [shape: bf16[3,12,8], index: 1, kind: input, shape index: {}]   ;;  %s5617_s2 = inlined_call_operand.vmem [shape: bf16[4,8], index: 2, kind: input, shape index: {}]   ;;  %s5618_s3 = inlined_call_operand.vmem [shape: f32[2,16,16,8], index: 3, kind: output, shape index: {0}]   ;;  %s5619_s4 = inlined_call_operand.vmem [shape: f32[2,16,16,8], index: 4, kind: output, shape index: {1}]   ;;  %s5620_s5 = inlined_call_operand.hbm [shape: f32[2,4,8], index: 5, kind: output, shape index: {2}]  }
   0x1   :  { %13 = vsyncpa [#allocation3 + $0x1], 0  ;;  %s4191_s18 = smov 0   ;;  %s4193_s19 = smov 0  }
   0x2   :  { %s4195_s20 = smov 0   ;;  %s4197_s21 = smov 0  }
   0x3 LB: > { %s4212_s22 = sadd.s32 4294967295, %s4156_s21   ;;  %s3052_s23 = sadd.s32 4294967294, %s4156_s21   ;;  %s4156_s21 = sphi %s4197_s21, %s5626_s21   ;;  %s4152_s20 = sphi %s4195_s20, %s5625_s20   ;;  %s4148_s19 = sphi %s4193_s19, %s5624_s19   ;;  %s4144_s18 = sphi %s4191_s18, %s5623_s18  }
   0x4   : > { %s4216_s24 = sadd.s32 1, %s4156_s21   ;;  %s146_s25 = sadd.s32 1, %s4152_s20 }
   0x5   : > { %s143_s26 = ssub.s32 %s4156_s21, %s4216_s24  ;;  %p156_p0 = scmp.ne.s32.totalorder %s4152_s20, %s4148_s19 }
   0x6   : > { %p144_p1 = scmp.eq.s32.totalorder %s143_s26, 0  ;;  %p157_p2 = scmp.eq.s32.totalorder %s4212_s22, 1 }
   0x7   : > { %p162_p3 = scmp.ne.s32.totalorder %s4148_s19, %s4144_s18  ;;  %p163_p4 = scmp.eq.s32.totalorder %s3052_s23, 1 }
   0x8   : > { %s4227_s27 = scalar_select %p144_p1, %s4152_s20, %s146_s25  }
   0x9   : > { %p4229_p5 = por %p157_p2, %p156_p0  ;;  %p4233_p6 = por %p163_p4, %p162_p3 }
   0xa   : > { %p3055_p7 = scmp.ge.s32.totalorder %s4156_s21, 1  ;;  %p195_p8 = scmp.lt.s32.totalorder %s4156_s21, 3 }
   0xc   : > { %p196_p9 = pnand %p3055_p7, %p195_p8 }
   0xd   : > { %p233_p10 = scmp.lt.s32.totalorder (!%p196_p9), %s4212_s22, 1  ;;  %s4158_s12 = smov (!%p196_p9), 8  }
   0xe   : > { %199 = sbr.rel (%p196_p9) target bundleno = 591 (0x24f), region = 32  ;;  %s4159_s13 = smov (!%p196_p9), 4  }
  0x13   : > { %s4241_s30 = scalar_select %p233_p10, %s4212_s22, 1  ;;  %v4093_v0 = vld [vmem:[%s5616_s1 + $0x8] sm:$0x3f]   ;;  %vm1175_vm0 = vcmask 1045504   ;;  %v4094_v32 = vld [vmem:[%s5616_s1] sm:$0x3f]  }
  0x14   : > { %3567 = vmatprep.subr.msk.bf16.mxu0 %vm1175_vm0, %v4093_v0  ;;  %v1177_v4 = vsel %vm1175_vm0, %v4093_v0, 0  ;;  %3568 = vmatprep.subr.msk.bf16.mxu1 %vm1175_vm0, %v4094_v32  ;;  %v1394_v33 = vsel %vm1175_vm0, %v4094_v32, 0  ;;  %vm2544_vm1 = vcmask 1041408   ;;  %vm601_vm2 = vcmask 31744  }
  0x15   : > { %s3571_s6 = smul.u32 432, %s4241_s30  ;;  %3432 = vmatpush3.bf16.msra.mxu0 %v1177_v4  ;;  %3466 = vmatpush3.bf16.msra.mxu1 %v1394_v33  ;;  %vm634_vm3 = vcmask 64512   ;;  %vm1126_vm4 = vcmask 97280   ;;  %s3361_s26 = sshll.u32 %s4241_s30, 8  ;;  %vm2343_vm5 = vcmask 57344  }
  0x16   : > { %s5130_s8 = scalar_lea.vmem %s5619_s4, %s3361_s26  ;;  %s5139_s30 = scalar_lea.vmem %s5618_s3, %s3361_s26 }
  0x17   : > { %s4250_s11 = scalar_lea.vmem %s5615_s0, %s3571_s6  ;;  %s4160_s26 = smov [#allocation2]  }
  0x18   : > { %v3126_v1 = vld [vmem:[%s4250_s11 + $0x1a] sm:$0xff]  ;;  %v3127_v2 = vld [vmem:[%s4250_s11 + $0x22] sm:$0xff]  ;;  %v3096_v7 = vld [vmem:[%s4250_s11 + $0x31] sm:$0xff]  ;;  %s4100_s6 = sshll.u32 %s4160_s26, 4  ;;  %s4101_s6 = int_to_ptr.vmem [resolvable:$false] %s4100_s6 }
  0x19   : > { %v3094_v3 = vld [vmem:[%s4250_s11 + $0x19] sm:$0xff]  ;;  %v3623_v5 = vpack.i.bf16 %v3127_v2, %v3126_v1  ;;  %v3095_v6 = vld [vmem:[%s4250_s11 + $0x21] sm:$0xff]  ;;  %v282_v11 = vld [vmem:[%s4250_s11 + $0x9] sm:$0xff]  ;;  %s4102_s7 = scalar_lea.vmem %s4101_s6, 128 }
  0x1a   : > { %v3097_v8 = vld [vmem:[%s4250_s11 + $0x39] sm:$0xff]  ;;  %v3613_v9 = vpack.i.bf16 %v3095_v6, %v3094_v3  ;;  %v281_v10 = vld [vmem:[%s4250_s11 + $0x1] sm:$0xff]  ;;  %v314_v18 = vld [vmem:[%s4250_s11 + $0xa] sm:$0xff] }
  0x1b   : > { %3624 = vrot.lane.b32.xlu1 %v3623_v5, %s4158_s12  ;;  %v3628_v12 = vpack.i.bf16 %v282_v11, %v281_v10  ;;  %v4264_v13 = vpack.i.bf16 %v3097_v8, %v3096_v7  ;;  %v3128_v14 = vld [vmem:[%s4250_s11 + $0x32] sm:$0xff]  ;;  %v3129_v15 = vld [vmem:[%s4250_s11 + $0x3a] sm:$0xff]  ;;  %v313_v17 = vld [vmem:[%s4250_s11 + $0x2] sm:$0xff] }
  0x1c   : > { %3614 = vrot.lane.b32.xlu0 %v3613_v9, %s4159_s13  ;;  %v4271_v16 = vpack.i.bf16 %v3129_v15, %v3128_v14  ;;  %v3643_v19 = vpack.i.bf16 %v314_v18, %v313_v17  ;;  %v3100_v20 = vld [vmem:[%s4250_s11 + $0x61] sm:$0xff]  ;;  %v3101_v21 = vld [vmem:[%s4250_s11 + $0x69] sm:$0xff]  ;;  %v3099_v23 = vld [vmem:[%s4250_s11 + $0x51] sm:$0xff] }
  0x1d   : > { %v3098_v22 = vld [vmem:[%s4250_s11 + $0x49] sm:$0xff]  ;;  %v4283_v24 = vpack.i.bf16 %v3101_v21, %v3100_v20  ;;  %v3131_v27 = vld [vmem:[%s4250_s11 + $0x52] sm:$0xff]  ;;  %v3103_v37 = vld [vmem:[%s4250_s11 + $0x81] sm:$0xff] }
  0x1e   : > { %v4286_v25 = vpack.i.bf16 %v3099_v23, %v3098_v22  ;;  %v3130_v26 = vld [vmem:[%s4250_s11 + $0x4a] sm:$0xff]  ;;  %v3132_v29 = vld [vmem:[%s4250_s11 + $0x62] sm:$0xff]  ;;  %v3105_v35 = vld [vmem:[%s4250_s11 + $0x99] sm:$0xff] }
  0x1f   : > { %3629 = vrot.lane.b32.xlu1 %v3628_v12, %s4159_s13  ;;  %v4294_v28 = vpack.i.bf16 %v3131_v27, %v3130_v26  ;;  %v3133_v30 = vld [vmem:[%s4250_s11 + $0x6a] sm:$0xff]  ;;  %v3102_v36 = vld [vmem:[%s4250_s11 + $0x79] sm:$0xff]  ;;  %v3135_v41 = vld [vmem:[%s4250_s11 + $0x82] sm:$0xff] }
  0x20   : > { %3619 = vrot.lane.b32.xlu0 %v4264_v13, %s4159_s13  ;;  %v4302_v31 = vpack.i.bf16 %v3133_v30, %v3132_v29  ;;  %v3104_v34 = vld [vmem:[%s4250_s11 + $0x91] sm:$0xff]  ;;  %v4323_v39 = vpack.i.bf16 %v3103_v37, %v3102_v36  ;;  %v3134_v40 = vld [vmem:[%s4250_s11 + $0x7a] sm:$0xff]  ;;  %v3109_v47 = vld [vmem:[%s4250_s11 + $0xc9] sm:$0xff] }
  0x21   : > { %v4319_v38 = vpack.i.bf16 %v3105_v35, %v3104_v34  ;;  %v4331_v42 = vpack.i.bf16 %v3135_v41, %v3134_v40  ;;  %v3136_v43 = vld [vmem:[%s4250_s11 + $0x92] sm:$0xff]  ;;  %v3137_v44 = vld [vmem:[%s4250_s11 + $0x9a] sm:$0xff]  ;;  %v3106_v48 = vld [vmem:[%s4250_s11 + $0xa9] sm:$0xff] }
  0x22   : > { %v4339_v45 = vpack.i.bf16 %v3137_v44, %v3136_v43  ;;  %v3108_v46 = vld [vmem:[%s4250_s11 + $0xc1] sm:$0xff]  ;;  %v3107_v49 = vld [vmem:[%s4250_s11 + $0xb1] sm:$0xff]  ;;  %v3113_v59 = vld [vmem:[%s4250_s11 + $0xf9] sm:$0xff] }
  0x23   : > { %3639 = vrot.lane.b32.xlu1 %v3613_v9, %s4159_s13  ;;  %v4351_v50 = vpack.i.bf16 %v3109_v47, %v3108_v46  ;;  %v4355_v51 = vpack.i.bf16 %v3107_v49, %v3106_v48  ;;  %v3138_v52 = vld [vmem:[%s4250_s11 + $0xaa] sm:$0xff]  ;;  %v3139_v53 = vld [vmem:[%s4250_s11 + $0xb2] sm:$0xff]  ;;  %v3140_v55 = vld [vmem:[%s4250_s11 + $0xc2] sm:$0xff] }
  0x24   : > { %3634 = vrot.lane.b32.xlu0 %v4271_v16, %s4158_s12  ;;  %v4363_v54 = vpack.i.bf16 %v3139_v53, %v3138_v52  ;;  %v3141_v56 = vld [vmem:[%s4250_s11 + $0xca] sm:$0xff]  ;;  %v3110_v60 = vld [vmem:[%s4250_s11 + $0xd9] sm:$0xff]  ;;  %v3111_v61 = vld [vmem:[%s4250_s11 + $0xe1] sm:$0xff] }
  0x25   : > { %v4371_v57 = vpack.i.bf16 %v3141_v56, %v3140_v55  ;;  %v3112_v58 = vld [vmem:[%s4250_s11 + $0xf1] sm:$0xff]  ;;  %v4387_v63 = vpack.i.bf16 %v3111_v61, %v3110_v60  ;;  %v3142_v0 = vld [vmem:[%s4250_s11 + $0xda] sm:$0xff]  ;;  %v3143_v1 = vld [vmem:[%s4250_s11 + $0xe2] sm:$0xff] }
  0x26   : > { %v4383_v62 = vpack.i.bf16 %v3113_v59, %v3112_v58  ;;  %v4394_v2 = vld [vmem:[%s5616_s1 + $0x10] sm:$0x3f]   ;;  %v2495_v3 = vld [vmem:[%s5617_s2] sm:$0x3]  ;;  %v4403_v4 = vpack.i.bf16 %v3143_v1, %v3142_v0  ;;  %v3148_v20 = vld [vmem:[%s4250_s11 + $0x122] sm:$0xff] }
  0x27   : > { %3649 = vrot.lane.b32.xlu1 %v3623_v5, %s4158_s12  ;;  %3570 = vmatprep.subr.msk.bf16.mxu1 %vm2544_vm1, %v2495_v3  ;;  %v3144_v5 = vld [vmem:[%s4250_s11 + $0xf2] sm:$0xff]  ;;  %v3145_v6 = vld [vmem:[%s4250_s11 + $0xfa] sm:$0xff]  ;;  %v4409_v7 = vsel %vm2544_vm1, %v2495_v3, 0  ;;  %v3117_v10 = vld [vmem:[%s4250_s11 + $0x129] sm:$0xff] }
  0x28   : > { %3644 = vrot.lane.b32.xlu0 %v3643_v19, %s4158_s12  ;;  %3569 = vmatprep.subr.msk.bf16.mxu0 %vm1175_vm0, %v4394_v2  ;;  %v4415_v8 = vpack.i.bf16 %v3145_v6, %v3144_v5  ;;  %v3116_v9 = vld [vmem:[%s4250_s11 + $0x121] sm:$0xff]  ;;  %v3114_v11 = vld [vmem:[%s4250_s11 + $0x109] sm:$0xff]  ;;  %v3115_v12 = vld [vmem:[%s4250_s11 + $0x111] sm:$0xff] }
  0x29   : > { %v4427_v14 = vpack.i.bf16 %v3117_v10, %v3116_v9  ;;  %v4431_v15 = vpack.i.bf16 %v3115_v12, %v3114_v11  ;;  %v3146_v17 = vld [vmem:[%s4250_s11 + $0x10a] sm:$0xff]  ;;  %v3147_v18 = vld [vmem:[%s4250_s11 + $0x112] sm:$0xff]  ;;  %v3119_v29 = vld [vmem:[%s4250_s11 + $0x141] sm:$0xff] }
  0x2a   : > { %v4439_v19 = vpack.i.bf16 %v3147_v18, %v3146_v17  ;;  %v3149_v21 = vld [vmem:[%s4250_s11 + $0x12a] sm:$0xff]  ;;  %v3121_v26 = vld [vmem:[%s4250_s11 + $0x159] sm:$0xff]  ;;  %v3151_v34 = vld [vmem:[%s4250_s11 + $0x142] sm:$0xff] }
  0x2b   : > { %3659 = vrot.lane.b32.xlu1 %v4283_v24, %s4159_s13  ;;  %v4447_v22 = vpack.i.bf16 %v3149_v21, %v3148_v20  ;;  %v3120_v23 = vld [vmem:[%s4250_s11 + $0x151] sm:$0xff]  ;;  %v3118_v27 = vld [vmem:[%s4250_s11 + $0x139] sm:$0xff]  ;;  %v3124_v41 = vld [vmem:[%s4250_s11 + $0x181] sm:$0xff] }
  0x2c   : > { %3654 = vrot.lane.b32.xlu0 %v4286_v25, %s4159_s13  ;;  %v4459_v30 = vpack.i.bf16 %v3121_v26, %v3120_v23  ;;  %v4463_v32 = vpack.i.bf16 %v3119_v29, %v3118_v27  ;;  %v3150_v33 = vld [vmem:[%s4250_s11 + $0x13a] sm:$0xff]  ;;  %v3152_v36 = vld [vmem:[%s4250_s11 + $0x152] sm:$0xff]  ;;  %v3125_v43 = vld [vmem:[%s4250_s11 + $0x189] sm:$0xff] }
  0x2d   : > { %v4471_v35 = vpack.i.bf16 %v3151_v34, %v3150_v33  ;;  %v3153_v37 = vld [vmem:[%s4250_s11 + $0x15a] sm:$0xff]  ;;  %v3122_v44 = vld [vmem:[%s4250_s11 + $0x169] sm:$0xff]  ;;  %v3123_v46 = vld [vmem:[%s4250_s11 + $0x171] sm:$0xff]  ;;  %v4491_v47 = vpack.i.bf16 %v3125_v43, %v3124_v41 }
  0x2e   : > { %v4479_v40 = vpack.i.bf16 %v3153_v37, %v3152_v36  ;;  %v4495_v48 = vpack.i.bf16 %v3123_v46, %v3122_v44  ;;  %v3154_v49 = vld [vmem:[%s4250_s11 + $0x16a] sm:$0xff]  ;;  %v3155_v52 = vld [vmem:[%s4250_s11 + $0x172] sm:$0xff]  ;;  %v3156_v56 = vld [vmem:[%s4250_s11 + $0x182] sm:$0xff] }
  0x2f   : > { %3669 = vrot.lane.b32.xlu1 %v4264_v13, %s4159_s13  ;;  %v4503_v53 = vpack.i.bf16 %v3155_v52, %v3154_v49  ;;  %v3157_v58 = vld [vmem:[%s4250_s11 + $0x18a] sm:$0xff]  ;;  %v3062_v0 = vld [vmem:[%s4250_s11 + $0x18] sm:$0xff]  ;;  %v3063_v1 = vld [vmem:[%s4250_s11 + $0x20] sm:$0xff] }
  0x30   : > { %3664 = vrot.lane.b32.xlu0 %v4294_v28, %s4158_s12  ;;  %v4513_v6 = vpack.i.bf16 %v3157_v58, %v3156_v56  ;;  %v4524_v26 = vld [vmem:[%s4250_s11 + $0x30] sm:$0xff]  ;;  %v4527_v27 = vld [vmem:[%s4250_s11 + $0x38] sm:$0xff]  ;;  %v249_v44 = vld [vmem:[%s4250_s11] sm:$0xff] }
  0x33   : > { %3679 = vrot.lane.b32.xlu1 %v4286_v25, %s4159_s13 }
  0x34   : > { %3674 = vrot.lane.b32.xlu0 %v4302_v31, %s4158_s12 }
  0x37   : > { %3689 = vrot.lane.b32.xlu1 %v4294_v28, %s4158_s12 }
  0x38   : > { %3684 = vrot.lane.b32.xlu0 %v4271_v16, %s4158_s12 }
  0x3b   : > { %3699 = vrot.lane.b32.xlu1 %v4319_v38, %s4159_s13 }
  0x3c   : > { %3694 = vrot.lane.b32.xlu0 %v4323_v39, %s4159_s13 }
  0x3f   : > { %3709 = vrot.lane.b32.xlu1 %v4283_v24, %s4159_s13 }
  0x40   : > { %3704 = vrot.lane.b32.xlu0 %v4331_v42, %s4158_s12 }
  0x43   : > { %3719 = vrot.lane.b32.xlu1 %v4323_v39, %s4159_s13 }
  0x44   : > { %3714 = vrot.lane.b32.xlu0 %v4339_v45, %s4158_s12 }
  0x47   : > { %3729 = vrot.lane.b32.xlu1 %v4331_v42, %s4158_s12 }
  0x48   : > { %3724 = vrot.lane.b32.xlu0 %v4302_v31, %s4158_s12 }
  0x4b   : > { %3739 = vrot.lane.b32.xlu1 %v4351_v50, %s4159_s13 }
  0x4c   : > { %3734 = vrot.lane.b32.xlu0 %v4355_v51, %s4159_s13 }
  0x4f   : > { %3749 = vrot.lane.b32.xlu1 %v4319_v38, %s4159_s13 }
  0x50   : > { %3744 = vrot.lane.b32.xlu0 %v4363_v54, %s4158_s12 }
  0x53   : > { %3759 = vrot.lane.b32.xlu1 %v4355_v51, %s4159_s13 }
  0x54   : > { %3754 = vrot.lane.b32.xlu0 %v4371_v57, %s4158_s12 }
  0x57   : > { %3769 = vrot.lane.b32.xlu1 %v4363_v54, %s4158_s12 }
  0x58   : > { %3764 = vrot.lane.b32.xlu0 %v4339_v45, %s4158_s12 }
  0x5b   : > { %3779 = vrot.lane.b32.xlu1 %v4383_v62, %s4159_s13 }
  0x5c   : > { %3774 = vrot.lane.b32.xlu0 %v4387_v63, %s4159_s13 }
  0x5f   : > { %3789 = vrot.lane.b32.xlu1 %v4351_v50, %s4159_s13 }
  0x60   : > { %3784 = vrot.lane.b32.xlu0 %v4403_v4, %s4158_s12 }
  0x63   : > { %3799 = vrot.lane.b32.xlu1 %v4387_v63, %s4159_s13 }
  0x64   : > { %3794 = vrot.lane.b32.xlu0 %v4415_v8, %s4158_s12 }
  0x67   : > { %3809 = vrot.lane.b32.xlu1 %v4403_v4, %s4158_s12 }
  0x68   : > { %3804 = vrot.lane.b32.xlu0 %v4371_v57, %s4158_s12 }
  0x6b   : > { %3819 = vrot.lane.b32.xlu1 %v4427_v14, %s4159_s13 }
  0x6c   : > { %3814 = vrot.lane.b32.xlu0 %v4431_v15, %s4159_s13 }
  0x6f   : > { %3829 = vrot.lane.b32.xlu1 %v4383_v62, %s4159_s13 }
  0x70   : > { %3824 = vrot.lane.b32.xlu0 %v4439_v19, %s4158_s12 }
  0x73   : > { %3839 = vrot.lane.b32.xlu1 %v4431_v15, %s4159_s13 }
  0x74   : > { %3834 = vrot.lane.b32.xlu0 %v4447_v22, %s4158_s12 }
  0x77   : > { %3849 = vrot.lane.b32.xlu1 %v4439_v19, %s4158_s12 }
  0x78   : > { %3844 = vrot.lane.b32.xlu0 %v4415_v8, %s4158_s12 }
  0x7b   : > { %3859 = vrot.lane.b32.xlu1 %v4459_v30, %s4159_s13 }
  0x7c   : > { %3854 = vrot.lane.b32.xlu0 %v4463_v32, %s4159_s13 }
  0x7f   : > { %3869 = vrot.lane.b32.xlu1 %v4427_v14, %s4159_s13 }
  0x80   : > { %3864 = vrot.lane.b32.xlu0 %v4471_v35, %s4158_s12 }
  0x83   : > { %3879 = vrot.lane.b32.xlu1 %v4463_v32, %s4159_s13 }
  0x84   : > { %3874 = vrot.lane.b32.xlu0 %v4479_v40, %s4158_s12 }
  0x87   : > { %3889 = vrot.lane.b32.xlu1 %v4471_v35, %s4158_s12 }
  0x88   : > { %3884 = vrot.lane.b32.xlu0 %v4447_v22, %s4158_s12 }
  0x8b   : > { %3899 = vrot.lane.b32.xlu1 %v4491_v47, %s4159_s13 }
  0x8c   : > { %3894 = vrot.lane.b32.xlu0 %v4495_v48, %s4159_s13 }
  0x8d   : > { %v3625_v55 = vpop.permute.xlu1 %3624 }
  0x8e   : > { %v3627_v59 = vunpack.i.h.bf16 %v3625_v55  ;;  %v3626_v60 = vunpack.i.l.bf16 %v3625_v55  ;;  %v3615_v61 = vpop.permute.xlu0 %3614 }
  0x8f   : > { %v3617_v3 = vunpack.i.h.bf16 %v3615_v61  ;;  %v3616_v5 = vunpack.i.l.bf16 %v3615_v61  ;;  %3909 = vrot.lane.b32.xlu1 %v4459_v30, %s4159_s13 }
  0x90   : > { %3904 = vrot.lane.b32.xlu0 %v4503_v53, %s4158_s12 }
  0x91   : > { %v3630_v9 = vpop.permute.xlu1 %3629  ;;  %v1038_v10 = vsel %vm601_vm2, %v3062_v0, %v3616_v5  ;;  %v1039_v11 = vsel %vm601_vm2, %v3063_v1, %v3617_v3 }
  0x92   : > { %v3620_v12 = vpop.permute.xlu0 %3619  ;;  %v1070_v17 = vsel %vm634_vm3, %v1038_v10, %v3626_v60  ;;  %v1071_v18 = vsel %vm634_vm3, %v1039_v11, %v3627_v59  ;;  %v3631_v33 = vunpack.i.l.bf16 %v3630_v9  ;;  %v3632_v52 = vunpack.i.h.bf16 %v3630_v9  ;;  %v250_v59 = vld [vmem:[%s4250_s11 + $0x8] sm:$0xff] }
  0x93   : > { %3919 = vrot.lane.b32.xlu1 %v4495_v48, %s4159_s13  ;;  %v1102_v20 = vpack.c.bf16 %v1071_v18, %v1070_v17  ;;  %v3622_v21 = vunpack.i.h.bf16 %v3620_v12  ;;  %v3621_v23 = vunpack.i.l.bf16 %v3620_v12  ;;  %v2047_v60 = vsel %vm1175_vm0, %v4394_v2, 0 }
  0x94   : > { %3914 = vrot.lane.b32.xlu0 %v4513_v6, %s4158_s12  ;;  %v602_v11 = vsel %vm601_vm2, %v249_v44, %v3631_v33  ;;  %v603_v2 = vsel %vm601_vm2, %v250_v59, %v3632_v52 }
  0x95   : > { %3433 = vmatprep.mubr.msk.bf16.mxu0 %vm1126_vm4, %v1102_v20  ;;  %v3640_v29 = vpop.permute.xlu1 %3639  ;;  %v1040_v46 = vsel %vm601_vm2, %v4524_v26, %v3621_v23  ;;  %v1041_v49 = vsel %vm601_vm2, %v4527_v27, %v3622_v21 }
  0x96   : > { %v3635_v34 = vpop.permute.xlu0 %3634  ;;  %v3642_v41 = vunpack.i.h.bf16 %v3640_v29  ;;  %v3641_v43 = vunpack.i.l.bf16 %v3640_v29 }
  0x97   : > { %v3637_v36 = vunpack.i.h.bf16 %v3635_v34  ;;  %v3636_v37 = vunpack.i.l.bf16 %v3635_v34  ;;  %3929 = vrot.lane.b32.xlu1 %v4503_v53, %s4158_s12 }
  0x98   : > { %3924 = vrot.lane.b32.xlu0 %v4479_v40, %s4158_s12  ;;  %v604_v9 = vsel %vm601_vm2, %v3062_v0, %v3641_v43  ;;  %v605_v12 = vsel %vm601_vm2, %v3063_v1, %v3642_v41 }
  0x99   : > { %v1072_v55 = vsel %vm634_vm3, %v1040_v46, %v3636_v37  ;;  %v1073_v56 = vsel %vm634_vm3, %v1041_v49, %v3637_v36  ;;  %v3650_v58 = vpop.permute.xlu1 %3649  ;;  %v3067_v37 = vld [vmem:[%s4250_s11 + $0x50] sm:$0xff] }
  0x9a   : > { %v1103_v61 = vpack.c.bf16 %v1073_v56, %v1072_v55  ;;  %v3645_v3 = vpop.permute.xlu0 %3644  ;;  %v3652_v5 = vunpack.i.h.bf16 %v3650_v58  ;;  %v3651_v10 = vunpack.i.l.bf16 %v3650_v58  ;;  %v4573_v55 = vld [vmem:[%s4250_s11 + $0x60] sm:$0xff]  ;;  %v4576_v56 = vld [vmem:[%s4250_s11 + $0x68] sm:$0xff] }
  0x9b   : > { %v3647_v17 = vunpack.i.h.bf16 %v3645_v3  ;;  %v3646_v18 = vunpack.i.l.bf16 %v3645_v3  ;;  %3939 = vrot.lane.b32.xlu1 %v4286_v25, %s4159_s13 }
  0x9c   : > { %v637_v20 = vsel %vm634_vm3, %v604_v9, %v3651_v10  ;;  %v638_v21 = vsel %vm634_vm3, %v605_v12, %v3652_v5  ;;  %3434 = vmatmul.mubr.msk.bf16.vlgmr.msra.gmra.mxu0 %vm1126_vm4, %v1103_v61  ;;  %3934 = vrot.lane.b32.xlu0 %v4264_v13, %s4159_s13  ;;  %v3066_v13 = vld [vmem:[%s4250_s11 + $0x48] sm:$0xff] }
  0x9d   : > { %v668_v0 = vpack.c.bf16 %v638_v21, %v637_v20  ;;  %v3660_v1 = vpop.permute.xlu1 %3659  ;;  %v635_v23 = vsel %vm634_vm3, %v602_v11, %v3646_v18  ;;  %v636_v29 = vsel %vm634_vm3, %v603_v2, %v3647_v17  ;;  %3500 = vmatpush3.bf16.msra.mxu0 %v2047_v60 }
  0x9e   : > { %v3655_v25 = vpop.permute.xlu0 %3654  ;;  %v667_v33 = vpack.c.bf16 %v636_v29, %v635_v23  ;;  %v3662_v49 = vunpack.i.h.bf16 %v3660_v1  ;;  %v3661_v52 = vunpack.i.l.bf16 %v3660_v1 }
  0x9f   : > { %3949 = vrot.lane.b32.xlu1 %v4294_v28, %s4158_s12  ;;  %v3657_v34 = vunpack.i.h.bf16 %v3655_v25  ;;  %v3656_v36 = vunpack.i.l.bf16 %v3655_v25 }
  0xa0   : > { %3944 = vrot.lane.b32.xlu0 %v4271_v16, %s4158_s12  ;;  %3467 = vmatprep.mubr.msk.bf16.mxu1 %vm1126_vm4, %v667_v33  ;;  %v1044_v9 = vsel %vm601_vm2, %v4573_v55, %v3661_v52 }
  0xa1   : > { %3468 = vmatmul.mubr.msk.bf16.vlgmr.msra.gmra.mxu1 %vm1126_vm4, %v668_v0  ;;  %v3670_v41 = vpop.permute.xlu1 %3669  ;;  %v1043_v28 = vsel %vm601_vm2, %v3067_v37, %v3657_v34  ;;  %v1042_v16 = vsel %vm601_vm2, %v3066_v13, %v3656_v36 }
  0xa2   : > { %v3665_v43 = vpop.permute.xlu0 %3664  ;;  %3534 = vmatpush3.bf16.msra.mxu1 %v4409_v7  ;;  %v3672_v12 = vunpack.i.h.bf16 %v3670_v41 }
  0xa3   : > { %v3667_v44 = vunpack.i.h.bf16 %v3665_v43  ;;  %v3666_v46 = vunpack.i.l.bf16 %v3665_v43  ;;  %3959 = vrot.lane.b32.xlu1 %v4323_v39, %s4159_s13  ;;  %v3671_v39 = vunpack.i.l.bf16 %v3670_v41 }
  0xa4   : > { %3954 = vrot.lane.b32.xlu0 %v4283_v24, %s4159_s13  ;;  %v1045_v24 = vsel %vm601_vm2, %v4576_v56, %v3662_v49  ;;  %v607_v33 = vsel %vm601_vm2, %v4527_v27, %v3672_v12 }
  0xa5   : > { %v1074_v7 = vsel %vm634_vm3, %v1042_v16, %v3666_v46  ;;  %v1075_v58 = vsel %vm634_vm3, %v1043_v28, %v3667_v44  ;;  %v3680_v59 = vpop.permute.xlu1 %3679  ;;  %v4615_v46 = vld [vmem:[%s4250_s11 + $0x80] sm:$0xff] }
  0xa6   : > { %v1104_v60 = vpack.c.bf16 %v1075_v58, %v1074_v7  ;;  %v3675_v61 = vpop.permute.xlu0 %3674  ;;  %v3682_v10 = vunpack.i.h.bf16 %v3680_v59  ;;  %v3681_v11 = vunpack.i.l.bf16 %v3680_v59  ;;  %v4627_v59 = vld [vmem:[%s4250_s11 + $0x90] sm:$0xff] }
  0xa7   : > { %v3677_v3 = vunpack.i.h.bf16 %v3675_v61  ;;  %v3676_v5 = vunpack.i.l.bf16 %v3675_v61  ;;  %3969 = vrot.lane.b32.xlu1 %v4331_v42, %s4158_s12  ;;  %v606_v42 = vsel %vm601_vm2, %v4524_v26, %v3671_v39 }
  0xa8   : > { %3964 = vrot.lane.b32.xlu0 %v4302_v31, %s4158_s12  ;;  %3437 = vmatprep.mubr.msk.bf16.mxu0 %vm1126_vm4, %v1104_v60  ;;  %v608_v23 = vsel %vm601_vm2, %v3066_v13, %v3681_v11  ;;  %v609_v29 = vsel %vm601_vm2, %v3067_v37, %v3682_v10  ;;  %v4630_v60 = vld [vmem:[%s4250_s11 + $0x98] sm:$0xff] }
  0xa9   : > { %v1076_v17 = vsel %vm634_vm3, %v1044_v9, %v3676_v5  ;;  %v1077_v18 = vsel %vm634_vm3, %v1045_v24, %v3677_v3  ;;  %v3690_v20 = vpop.permute.xlu1 %3689 }
  0xaa   : > { %v1105_v21 = vpack.c.bf16 %v1077_v18, %v1076_v17  ;;  %v3685_v2 = vpop.permute.xlu0 %3684  ;;  %v3692_v0 = vunpack.i.h.bf16 %v3690_v20  ;;  %v3691_v1 = vunpack.i.l.bf16 %v3690_v20 }
  0xab   : > { %v3687_v25 = vunpack.i.h.bf16 %v3685_v2  ;;  %v3686_v31 = vunpack.i.l.bf16 %v3685_v2  ;;  %3979 = vrot.lane.b32.xlu1 %v4355_v51, %s4159_s13 }
  0xac   : > { %v641_v34 = vsel %vm634_vm3, %v608_v23, %v3691_v1  ;;  %v642_v26 = vsel %vm634_vm3, %v609_v29, %v3692_v0  ;;  %3974 = vrot.lane.b32.xlu0 %v4319_v38, %s4159_s13  ;;  %3438 = vmatmul.mubr.msk.bf16.gmra.mxu0 %vm1126_vm4, %v1105_v21  ;;  %v4612_v38 = vld [vmem:[%s4250_s11 + $0x78] sm:$0xff] }
  0xad   : > { %v639_v36 = vsel %vm634_vm3, %v606_v42, %v3686_v31  ;;  %v640_v13 = vsel %vm634_vm3, %v607_v33, %v3687_v25  ;;  %v670_v37 = vpack.c.bf16 %v642_v26, %v641_v34  ;;  %v3700_v51 = vpop.permute.xlu1 %3699 }
  0xae   : > { %v669_v41 = vpack.c.bf16 %v640_v13, %v639_v36  ;;  %v3695_v43 = vpop.permute.xlu0 %3694  ;;  %v3702_v7 = vunpack.i.h.bf16 %v3700_v51  ;;  %v3701_v58 = vunpack.i.l.bf16 %v3700_v51 }
  0xaf   : > { %3989 = vrot.lane.b32.xlu1 %v4363_v54, %s4158_s12  ;;  %v3697_v27 = vunpack.i.h.bf16 %v3695_v43  ;;  %v3696_v44 = vunpack.i.l.bf16 %v3695_v43  ;;  %v4671_v43 = vld [vmem:[%s4250_s11 + $0xb0] sm:$0xff] }
  0xb0   : > { %3984 = vrot.lane.b32.xlu0 %v4339_v45, %s4158_s12  ;;  %3471 = vmatprep.mubr.msk.bf16.mxu1 %vm1126_vm4, %v669_v41  ;;  %v1048_v17 = vsel %vm601_vm2, %v4627_v59, %v3701_v58 }
  0xb1   : > { %3472 = vmatmul.mubr.msk.bf16.gmra.mxu1 %vm1126_vm4, %v670_v37  ;;  %v3710_v28 = vpop.permute.xlu1 %3709  ;;  %v1047_v54 = vsel %vm601_vm2, %v4615_v46, %v3697_v27  ;;  %v1046_v45 = vsel %vm601_vm2, %v4612_v38, %v3696_v44 }
  0xb2   : > { %v3705_v16 = vpop.permute.xlu0 %3704  ;;  %v3711_v5 = vunpack.i.l.bf16 %v3710_v28  ;;  %v3712_v18 = vunpack.i.h.bf16 %v3710_v28 }
  0xb3   : > { %v3707_v49 = vunpack.i.h.bf16 %v3705_v16  ;;  %v3706_v52 = vunpack.i.l.bf16 %v3705_v16  ;;  %3999 = vrot.lane.b32.xlu1 %v4387_v63, %s4159_s13 }
  0xb4   : > { %3994 = vrot.lane.b32.xlu0 %v4351_v50, %s4159_s13  ;;  %v1049_v50 = vsel %vm601_vm2, %v4630_v60, %v3702_v7  ;;  %v611_v33 = vsel %vm601_vm2, %v4576_v56, %v3712_v18 }
  0xb5   : > { %v1078_v39 = vsel %vm634_vm3, %v1046_v45, %v3706_v52  ;;  %v1079_v61 = vsel %vm634_vm3, %v1047_v54, %v3707_v49  ;;  %v3720_v63 = vpop.permute.xlu1 %3719  ;;  %v4683_v54 = vld [vmem:[%s4250_s11 + $0xc0] sm:$0xff]  ;;  %v4686_v45 = vld [vmem:[%s4250_s11 + $0xc8] sm:$0xff] }
  0xb6   : > { %v1106_v3 = vpack.c.bf16 %v1079_v61, %v1078_v39  ;;  %v3715_v10 = vpop.permute.xlu0 %3714  ;;  %v3722_v9 = vunpack.i.h.bf16 %v3720_v63  ;;  %v3721_v12 = vunpack.i.l.bf16 %v3720_v63 }
  0xb7   : > { %v3717_v11 = vunpack.i.h.bf16 %v3715_v10  ;;  %v3716_v24 = vunpack.i.l.bf16 %v3715_v10  ;;  %4009 = vrot.lane.b32.xlu1 %v4403_v4, %s4158_s12  ;;  %v610_v4 = vsel %vm601_vm2, %v4573_v55, %v3711_v5 }
  0xb8   : > { %4004 = vrot.lane.b32.xlu0 %v4371_v57, %s4158_s12  ;;  %3441 = vmatprep.mubr.msk.bf16.mxu0 %vm1126_vm4, %v1106_v3  ;;  %v612_v29 = vsel %vm601_vm2, %v4612_v38, %v3721_v12  ;;  %v613_v57 = vsel %vm601_vm2, %v4615_v46, %v3722_v9 }
  0xb9   : > { %v1080_v20 = vsel %vm634_vm3, %v1048_v17, %v3716_v24  ;;  %v1081_v42 = vsel %vm634_vm3, %v1049_v50, %v3717_v11  ;;  %v3730_v21 = vpop.permute.xlu1 %3729 }
  0xba   : > { %v1107_v2 = vpack.c.bf16 %v1081_v42, %v1080_v20  ;;  %v3725_v0 = vpop.permute.xlu0 %3724  ;;  %v3732_v1 = vunpack.i.h.bf16 %v3730_v21  ;;  %v3731_v23 = vunpack.i.l.bf16 %v3730_v21 }
  0xbb   : > { %v3727_v25 = vunpack.i.h.bf16 %v3725_v0  ;;  %v3726_v31 = vunpack.i.l.bf16 %v3725_v0  ;;  %4019 = vrot.lane.b32.xlu1 %v4431_v15, %s4159_s13 }
  0xbc   : > { %v645_v55 = vsel %vm634_vm3, %v612_v29, %v3731_v23  ;;  %v646_v34 = vsel %vm634_vm3, %v613_v57, %v3732_v1  ;;  %4014 = vrot.lane.b32.xlu0 %v4383_v62, %s4159_s13  ;;  %3442 = vmatmul.mubr.msk.bf16.gmra.mxu0 %vm1126_vm4, %v1107_v2  ;;  %v4668_v62 = vld [vmem:[%s4250_s11 + $0xa8] sm:$0xff]  ;;  %v3256_v57 = vld [vmem:[%s4250_s11 + $0x199] sm:$0xff] }
  0xbd   : > { %v643_v26 = vsel %vm634_vm3, %v610_v4, %v3726_v31  ;;  %v644_v36 = vsel %vm634_vm3, %v611_v33, %v3727_v25  ;;  %v672_v13 = vpack.c.bf16 %v646_v34, %v645_v55  ;;  %v3740_v15 = vpop.permute.xlu1 %3739  ;;  %v3257_v25 = vld [vmem:[%s4250_s11 + $0x1a1] sm:$0xff] }
  0xbe   : > { %v671_v37 = vpack.c.bf16 %v644_v36, %v643_v26  ;;  %v3735_v51 = vpop.permute.xlu0 %3734  ;;  %v3742_v49 = vunpack.i.h.bf16 %v3740_v15  ;;  %v3741_v52 = vunpack.i.l.bf16 %v3740_v15  ;;  %v3288_v15 = vld [vmem:[%s4250_s11 + $0x19a] sm:$0xff] }
  0xbf   : > { %4029 = vrot.lane.b32.xlu1 %v4439_v19, %s4158_s12  ;;  %v3737_v56 = vunpack.i.h.bf16 %v3735_v51  ;;  %v3736_v41 = vunpack.i.l.bf16 %v3735_v51  ;;  %v4728_v51 = vld [vmem:[%s4250_s11 + $0xd8] sm:$0xff] }
  0xc0   : > { %4024 = vrot.lane.b32.xlu0 %v4415_v8, %s4158_s12  ;;  %3475 = vmatprep.mubr.msk.bf16.mxu1 %vm1126_vm4, %v671_v37  ;;  %v1052_v24 = vsel %vm601_vm2, %v4683_v54, %v3741_v52  ;;  %v3289_v37 = vld [vmem:[%s4250_s11 + $0x1a2] sm:$0xff]  ;;  %v4745_v52 = vld [vmem:[%s4250_s11 + $0xf8] sm:$0xff] }
  0xc1   : > { %3476 = vmatmul.mubr.msk.bf16.gmra.mxu1 %vm1126_vm4, %v672_v13  ;;  %v3750_v27 = vpop.permute.xlu1 %3749  ;;  %v1051_v19 = vsel %vm601_vm2, %v4671_v43, %v3737_v56  ;;  %v1050_v8 = vsel %vm601_vm2, %v4668_v62, %v3736_v41  ;;  %v4731_v56 = vld [vmem:[%s4250_s11 + $0xe0] sm:$0xff] }
  0xc2   : > { %v3745_v44 = vpop.permute.xlu0 %3744  ;;  %v3751_v61 = vunpack.i.l.bf16 %v3750_v27  ;;  %v3752_v9 = vunpack.i.h.bf16 %v3750_v27 }
  0xc3   : > { %v3747_v28 = vunpack.i.h.bf16 %v3745_v44  ;;  %v3746_v16 = vunpack.i.l.bf16 %v3745_v44  ;;  %4039 = vrot.lane.b32.xlu1 %v4463_v32, %s4159_s13 }
  0xc4   : > { %4034 = vrot.lane.b32.xlu0 %v4427_v14, %s4159_s13  ;;  %v1053_v14 = vsel %vm601_vm2, %v4686_v45, %v3742_v49  ;;  %v615_v1 = vsel %vm601_vm2, %v4630_v60, %v3752_v9  ;;  %v4742_v49 = vld [vmem:[%s4250_s11 + $0xf0] sm:$0xff] }
  0xc5   : > { %v1082_v7 = vsel %vm634_vm3, %v1050_v8, %v3746_v16  ;;  %v1083_v58 = vsel %vm634_vm3, %v1051_v19, %v3747_v28  ;;  %v3760_v32 = vpop.permute.xlu1 %3759  ;;  %v4088_v28 = vpack.i.bf16 %v3289_v37, %v3288_v15 }
  0xc6   : > { %v1108_v39 = vpack.c.bf16 %v1083_v58, %v1082_v7  ;;  %v3755_v63 = vpop.permute.xlu0 %3754  ;;  %v3762_v10 = vunpack.i.h.bf16 %v3760_v32  ;;  %v3761_v11 = vunpack.i.l.bf16 %v3760_v32 }
  0xc7   : > { %v3757_v3 = vunpack.i.h.bf16 %v3755_v63  ;;  %v3756_v5 = vunpack.i.l.bf16 %v3755_v63  ;;  %4049 = vrot.lane.b32.xlu1 %v4471_v35, %s4158_s12  ;;  %v614_v35 = vsel %vm601_vm2, %v4627_v59, %v3751_v61 }
  0xc8   : > { %4044 = vrot.lane.b32.xlu0 %v4447_v22, %s4158_s12  ;;  %3445 = vmatprep.mubr.msk.bf16.mxu0 %vm1126_vm4, %v1108_v39  ;;  %v616_v4 = vsel %vm601_vm2, %v4668_v62, %v3761_v11  ;;  %v617_v22 = vsel %vm601_vm2, %v4671_v43, %v3762_v10 }
  0xc9   : > { %v1084_v12 = vsel %vm634_vm3, %v1052_v24, %v3756_v5  ;;  %v1085_v50 = vsel %vm634_vm3, %v1053_v14, %v3757_v3  ;;  %v3770_v17 = vpop.permute.xlu1 %3769 }
  0xca   : > { %v1109_v18 = vpack.c.bf16 %v1085_v50, %v1084_v12  ;;  %v3765_v20 = vpop.permute.xlu0 %3764  ;;  %v3772_v42 = vunpack.i.h.bf16 %v3770_v17  ;;  %v3771_v21 = vunpack.i.l.bf16 %v3770_v17 }
  0xcb   : > { %v3767_v2 = vunpack.i.h.bf16 %v3765_v20  ;;  %v3766_v0 = vunpack.i.l.bf16 %v3765_v20  ;;  %4059 = vrot.lane.b32.xlu1 %v4495_v48, %s4159_s13 }
  0xcc   : > { %v649_v23 = vsel %vm634_vm3, %v616_v4, %v3771_v21  ;;  %v650_v29 = vsel %vm634_vm3, %v617_v22, %v3772_v42  ;;  %4054 = vrot.lane.b32.xlu0 %v4459_v30, %s4159_s13  ;;  %3446 = vmatmul.mubr.msk.bf16.gmra.mxu0 %vm1126_vm4, %v1109_v18  ;;  %v4078_v30 = vpack.i.bf16 %v3257_v25, %v3256_v57 }
  0xcd   : > { %v647_v48 = vsel %vm634_vm3, %v614_v35, %v3766_v0  ;;  %v648_v31 = vsel %vm634_vm3, %v615_v1, %v3767_v2  ;;  %v674_v33 = vpack.c.bf16 %v650_v29, %v649_v23  ;;  %v3780_v55 = vpop.permute.xlu1 %3779 }
  0xce   : > { %v673_v34 = vpack.c.bf16 %v648_v31, %v647_v48  ;;  %v3775_v26 = vpop.permute.xlu0 %3774  ;;  %v3782_v19 = vunpack.i.h.bf16 %v3780_v55  ;;  %v3781_v8 = vunpack.i.l.bf16 %v3780_v55 }
  0xcf   : > { %4069 = vrot.lane.b32.xlu1 %v4503_v53, %s4158_s12  ;;  %v3777_v36 = vunpack.i.h.bf16 %v3775_v26  ;;  %v3776_v13 = vunpack.i.l.bf16 %v3775_v26  ;;  %v4777_v26 = vld [vmem:[%s4250_s11 + $0x110] sm:$0xff] }
  0xd0   : > { %4064 = vrot.lane.b32.xlu0 %v4479_v40, %s4158_s12  ;;  %3479 = vmatprep.mubr.msk.bf16.mxu1 %vm1126_vm4, %v673_v34  ;;  %v1056_v11 = vsel %vm601_vm2, %v4742_v49, %v3781_v8  ;;  %v4774_v34 = vld [vmem:[%s4250_s11 + $0x108] sm:$0xff] }
  0xd1   : > { %3480 = vmatmul.mubr.msk.bf16.gmra.mxu1 %vm1126_vm4, %v674_v33  ;;  %v3790_v41 = vpop.permute.xlu1 %3789  ;;  %v1055_v40 = vsel %vm601_vm2, %v4731_v56, %v3777_v36  ;;  %v1054_v16 = vsel %vm601_vm2, %v4728_v51, %v3776_v13 }
  0xd2   : > { %v3785_v53 = vpop.permute.xlu0 %3784  ;;  %v3792_v14 = vunpack.i.h.bf16 %v3790_v41  ;;  %v3791_v24 = vunpack.i.l.bf16 %v3790_v41 }
  0xd3   : > { %v3787_v27 = vunpack.i.h.bf16 %v3785_v53  ;;  %v3786_v44 = vunpack.i.l.bf16 %v3785_v53  ;;  %4079 = vrot.lane.b32.xlu1 %v4078_v30, %s4159_s13 }
  0xd4   : > { %4074 = vrot.lane.b32.xlu0 %v4491_v47, %s4159_s13  ;;  %v1057_v47 = vsel %vm601_vm2, %v4745_v52, %v3782_v19  ;;  %v618_v22 = vsel %vm601_vm2, %v4683_v54, %v3791_v24  ;;  %v619_v2 = vsel %vm601_vm2, %v4686_v45, %v3792_v14  ;;  %s3358_s13 = sshll.u32 %s4212_s22, 6 }
  0xd5   : > { %v1086_v7 = vsel %vm634_vm3, %v1054_v16, %v3786_v44  ;;  %v1087_v58 = vsel %vm634_vm3, %v1055_v40, %v3787_v27  ;;  %v3800_v32 = vpop.permute.xlu1 %3799  ;;  %v4785_v44 = vld [vmem:[%s4250_s11 + $0x120] sm:$0xff]  ;;  %s2941_s23 = scalar_lea.hbm %s5620_s5, %s3358_s13 }
  0xd6   : > { %v1110_v39 = vpack.c.bf16 %v1087_v58, %v1086_v7  ;;  %v3795_v61 = vpop.permute.xlu0 %3794  ;;  %v3802_v5 = vunpack.i.h.bf16 %v3800_v32  ;;  %v3801_v10 = vunpack.i.l.bf16 %v3800_v32 }
  0xd7   : > { %v3797_v63 = vunpack.i.h.bf16 %v3795_v61  ;;  %v3796_v3 = vunpack.i.l.bf16 %v3795_v61  ;;  %4089 = vrot.lane.b32.xlu1 %v4088_v28, %s4158_s12  ;;  %v4788_v28 = vld [vmem:[%s4250_s11 + $0x128] sm:$0xff] }
  0xd8   : > { %4084 = vrot.lane.b32.xlu0 %v4513_v6, %s4158_s12  ;;  %3449 = vmatprep.mubr.msk.bf16.mxu0 %vm1126_vm4, %v1110_v39  ;;  %v620_v42 = vsel %vm601_vm2, %v4728_v51, %v3801_v10  ;;  %v621_v21 = vsel %vm601_vm2, %v4731_v56, %v3802_v5 }
  0xd9   : > { %v1088_v9 = vsel %vm634_vm3, %v1056_v11, %v3796_v3  ;;  %v1089_v12 = vsel %vm634_vm3, %v1057_v47, %v3797_v63  ;;  %v3810_v50 = vpop.permute.xlu1 %3809 }
  0xda   : > { %v1111_v17 = vpack.c.bf16 %v1089_v12, %v1088_v9  ;;  %v3805_v35 = vpop.permute.xlu0 %3804  ;;  %v3812_v18 = vunpack.i.h.bf16 %v3810_v50  ;;  %v3811_v20 = vunpack.i.l.bf16 %v3810_v50 }
  0xdb   : > { %v3807_v4 = vunpack.i.h.bf16 %v3805_v35  ;;  %v3806_v6 = vunpack.i.l.bf16 %v3805_v35 }
  0xdc   : > { %v653_v0 = vsel %vm634_vm3, %v620_v42, %v3811_v20  ;;  %v654_v1 = vsel %vm634_vm3, %v621_v21, %v3812_v18  ;;  %3450 = vmatmul.mubr.msk.bf16.gmra.mxu0 %vm1126_vm4, %v1111_v17 }
  0xdd   : > { %v651_v23 = vsel %vm634_vm3, %v618_v22, %v3806_v6  ;;  %v652_v29 = vsel %vm634_vm3, %v619_v2, %v3807_v4  ;;  %v676_v57 = vpack.c.bf16 %v654_v1, %v653_v0  ;;  %v3820_v25 = vpop.permute.xlu1 %3819 }
  0xde   : > { %v675_v48 = vpack.c.bf16 %v652_v29, %v651_v23  ;;  %v3815_v31 = vpop.permute.xlu0 %3814  ;;  %v3822_v53 = vunpack.i.h.bf16 %v3820_v25  ;;  %v3821_v27 = vunpack.i.l.bf16 %v3820_v25 }
  0xdf   : > { %v3817_v33 = vunpack.i.h.bf16 %v3815_v31  ;;  %v3816_v55 = vunpack.i.l.bf16 %v3815_v31  ;;  %v4817_v31 = vld [vmem:[%s4250_s11 + $0x140] sm:$0xff] }
  0xe0   : > { %3483 = vmatprep.mubr.msk.bf16.mxu1 %vm1126_vm4, %v675_v48  ;;  %v1061_v63 = vsel %vm601_vm2, %v4788_v28, %v3822_v53  ;;  %v1060_v3 = vsel %vm601_vm2, %v4785_v44, %v3821_v27  ;;  %v4814_v48 = vld [vmem:[%s4250_s11 + $0x138] sm:$0xff]  ;;  %v4825_v53 = vld [vmem:[%s4250_s11 + $0x150] sm:$0xff] }
  0xe1   : > { %3484 = vmatmul.mubr.msk.bf16.gmra.mxu1 %vm1126_vm4, %v676_v57  ;;  %v3830_v30 = vpop.permute.xlu1 %3829  ;;  %v1059_v37 = vsel %vm601_vm2, %v4777_v26, %v3817_v33  ;;  %v1058_v41 = vsel %vm601_vm2, %v4774_v34, %v3816_v55  ;;  %v4828_v27 = vld [vmem:[%s4250_s11 + $0x158] sm:$0xff] }
  0xe2   : > { %v3825_v36 = vpop.permute.xlu0 %3824  ;;  %v3832_v5 = vunpack.i.h.bf16 %v3830_v30  ;;  %v3831_v10 = vunpack.i.l.bf16 %v3830_v30 }
  0xe3   : > { %v3827_v13 = vunpack.i.h.bf16 %v3825_v36  ;;  %v3826_v15 = vunpack.i.l.bf16 %v3825_v36 }
  0xe4   : > { %v622_v42 = vsel %vm601_vm2, %v4742_v49, %v3831_v10  ;;  %v623_v21 = vsel %vm601_vm2, %v4745_v52, %v3832_v5 }
  0xe5   : > { %v1090_v40 = vsel %vm634_vm3, %v1058_v41, %v3826_v15  ;;  %v1091_v16 = vsel %vm634_vm3, %v1059_v37, %v3827_v13  ;;  %v3840_v19 = vpop.permute.xlu1 %3839 }
  0xe6   : > { %v1112_v8 = vpack.c.bf16 %v1091_v16, %v1090_v40  ;;  %v3835_v7 = vpop.permute.xlu0 %3834  ;;  %v3842_v39 = vunpack.i.h.bf16 %v3840_v19  ;;  %v3841_v61 = vunpack.i.l.bf16 %v3840_v19 }
  0xe7   : > { %v3837_v58 = vunpack.i.h.bf16 %v3835_v7  ;;  %v3836_v32 = vunpack.i.l.bf16 %v3835_v7 }
  0xe8   : > { %3453 = vmatprep.mubr.msk.bf16.mxu0 %vm1126_vm4, %v1112_v8  ;;  %v624_v17 = vsel %vm601_vm2, %v4774_v34, %v3841_v61  ;;  %v625_v35 = vsel %vm601_vm2, %v4777_v26, %v3842_v39 }
  0xe9   : > { %v1092_v47 = vsel %vm634_vm3, %v1060_v3, %v3836_v32  ;;  %v1093_v11 = vsel %vm634_vm3, %v1061_v63, %v3837_v58  ;;  %v3850_v14 = vpop.permute.xlu1 %3849 }
  0xea   : > { %v1113_v24 = vpack.c.bf16 %v1093_v11, %v1092_v47  ;;  %v3845_v9 = vpop.permute.xlu0 %3844  ;;  %v3852_v12 = vunpack.i.h.bf16 %v3850_v14  ;;  %v3851_v50 = vunpack.i.l.bf16 %v3850_v14 }
  0xeb   : > { %v3847_v18 = vunpack.i.h.bf16 %v3845_v9  ;;  %v3846_v20 = vunpack.i.l.bf16 %v3845_v9 }
  0xec   : > { %v657_v4 = vsel %vm634_vm3, %v624_v17, %v3851_v50  ;;  %v658_v6 = vsel %vm634_vm3, %v625_v35, %v3852_v12  ;;  %3454 = vmatmul.mubr.msk.bf16.gmra.mxu0 %vm1126_vm4, %v1113_v24 }
  0xed   : > { %v655_v22 = vsel %vm634_vm3, %v622_v42, %v3846_v20  ;;  %v656_v2 = vsel %vm634_vm3, %v623_v21, %v3847_v18  ;;  %v678_v0 = vpack.c.bf16 %v658_v6, %v657_v4  ;;  %v3860_v1 = vpop.permute.xlu1 %3859 }
  0xee   : > { %v677_v23 = vpack.c.bf16 %v656_v2, %v655_v22  ;;  %v3855_v29 = vpop.permute.xlu0 %3854  ;;  %v3862_v37 = vunpack.i.h.bf16 %v3860_v1  ;;  %v3861_v41 = vunpack.i.l.bf16 %v3860_v1 }
  0xef   : > { %v3857_v57 = vunpack.i.h.bf16 %v3855_v29  ;;  %v3856_v25 = vunpack.i.l.bf16 %v3855_v29 }
  0xf0   : > { %3487 = vmatprep.mubr.msk.bf16.mxu1 %vm1126_vm4, %v677_v23  ;;  %v1065_v63 = vsel %vm601_vm2, %v4828_v27, %v3862_v37  ;;  %v1064_v3 = vsel %vm601_vm2, %v4825_v53, %v3861_v41 }
  0xf1   : > { %3488 = vmatmul.mubr.msk.bf16.gmra.mxu1 %vm1126_vm4, %v678_v0  ;;  %v3870_v33 = vpop.permute.xlu1 %3869  ;;  %v1063_v13 = vsel %vm601_vm2, %v4817_v31, %v3857_v57  ;;  %v1062_v15 = vsel %vm601_vm2, %v4814_v48, %v3856_v25 }
  0xf2   : > { %v3865_v55 = vpop.permute.xlu0 %3864  ;;  %v3872_v5 = vunpack.i.h.bf16 %v3870_v33  ;;  %v3871_v10 = vunpack.i.l.bf16 %v3870_v33  ;;  %v4854_v33 = vld [vmem:[%s4250_s11 + $0x168] sm:$0xff] }
  0xf3   : > { %v3867_v30 = vunpack.i.h.bf16 %v3865_v55  ;;  %v3866_v36 = vunpack.i.l.bf16 %v3865_v55  ;;  %v4857_v55 = vld [vmem:[%s4250_s11 + $0x170] sm:$0xff] }
  0xf4   : > { %v626_v42 = vsel %vm601_vm2, %v4785_v44, %v3871_v10  ;;  %v627_v21 = vsel %vm601_vm2, %v4788_v28, %v3872_v5 }
  0xf5   : > { %v1094_v40 = vsel %vm634_vm3, %v1062_v15, %v3866_v36  ;;  %v1095_v16 = vsel %vm634_vm3, %v1063_v13, %v3867_v30  ;;  %v3880_v19 = vpop.permute.xlu1 %3879 }
  0xf6   : > { %v1114_v8 = vpack.c.bf16 %v1095_v16, %v1094_v40  ;;  %v3875_v7 = vpop.permute.xlu0 %3874  ;;  %v3882_v39 = vunpack.i.h.bf16 %v3880_v19  ;;  %v3881_v61 = vunpack.i.l.bf16 %v3880_v19  ;;  %v4865_v19 = vld [vmem:[%s4250_s11 + $0x180] sm:$0xff] }
  0xf7   : > { %v3877_v58 = vunpack.i.h.bf16 %v3875_v7  ;;  %v3876_v32 = vunpack.i.l.bf16 %v3875_v7 }
  0xf8   : > { %3457 = vmatprep.mubr.msk.bf16.mxu0 %vm1126_vm4, %v1114_v8  ;;  %v628_v17 = vsel %vm601_vm2, %v4814_v48, %v3881_v61  ;;  %v629_v35 = vsel %vm601_vm2, %v4817_v31, %v3882_v39  ;;  %v4868_v8 = vld [vmem:[%s4250_s11 + $0x188] sm:$0xff] }
  0xf9   : > { %v1096_v47 = vsel %vm634_vm3, %v1064_v3, %v3876_v32  ;;  %v1097_v11 = vsel %vm634_vm3, %v1065_v63, %v3877_v58  ;;  %v3890_v14 = vpop.permute.xlu1 %3889 }
  0xfa   : > { %v1115_v24 = vpack.c.bf16 %v1097_v11, %v1096_v47  ;;  %v3885_v9 = vpop.permute.xlu0 %3884  ;;  %v3892_v12 = vunpack.i.h.bf16 %v3890_v14  ;;  %v3891_v50 = vunpack.i.l.bf16 %v3890_v14 }
  0xfb   : > { %v3887_v18 = vunpack.i.h.bf16 %v3885_v9  ;;  %v3886_v20 = vunpack.i.l.bf16 %v3885_v9 }
  0xfc   : > { %v661_v4 = vsel %vm634_vm3, %v628_v17, %v3891_v50  ;;  %v662_v6 = vsel %vm634_vm3, %v629_v35, %v3892_v12  ;;  %3458 = vmatmul.mubr.msk.bf16.gmra.mxu0 %vm1126_vm4, %v1115_v24 }
  0xfd   : > { %v659_v22 = vsel %vm634_vm3, %v626_v42, %v3886_v20  ;;  %v660_v2 = vsel %vm634_vm3, %v627_v21, %v3887_v18  ;;  %v680_v0 = vpack.c.bf16 %v662_v6, %v661_v4  ;;  %v3900_v1 = vpop.permute.xlu1 %3899 }
  0xfe   : > { %v679_v23 = vpack.c.bf16 %v660_v2, %v659_v22  ;;  %v3895_v29 = vpop.permute.xlu0 %3894  ;;  %v3902_v40 = vunpack.i.h.bf16 %v3900_v1  ;;  %v3901_v16 = vunpack.i.l.bf16 %v3900_v1  ;;  %v3309_v22 = vld [vmem:[%s4250_s11 + $0x19] sm:$0xff]  ;;  %v3310_v2 = vld [vmem:[%s4250_s11 + $0x21] sm:$0xff] }
  0xff   : > { %v3897_v57 = vunpack.i.h.bf16 %v3895_v29  ;;  %v3896_v25 = vunpack.i.l.bf16 %v3895_v29 }
 0x100   : > { %3491 = vmatprep.mubr.msk.bf16.mxu1 %vm1126_vm4, %v679_v23  ;;  %v1069_v47 = vsel %vm601_vm2, %v4868_v8, %v3902_v40  ;;  %v1068_v11 = vsel %vm601_vm2, %v4865_v19, %v3901_v16 }
 0x101   : > { %3492 = vmatmul.mubr.msk.bf16.gmra.mxu1 %vm1126_vm4, %v680_v0  ;;  %v3910_v30 = vpop.permute.xlu1 %3909  ;;  %v1067_v37 = vsel %vm601_vm2, %v4857_v55, %v3897_v57  ;;  %v1066_v41 = vsel %vm601_vm2, %v4854_v33, %v3896_v25 }
 0x102   : > { %v3905_v36 = vpop.permute.xlu0 %3904  ;;  %v3912_v14 = vunpack.i.h.bf16 %v3910_v30  ;;  %v3911_v24 = vunpack.i.l.bf16 %v3910_v30 }
 0x103   : > { %v3907_v13 = vunpack.i.h.bf16 %v3905_v36  ;;  %v3906_v15 = vunpack.i.l.bf16 %v3905_v36 }
 0x104   : > { %v630_v0 = vsel %vm601_vm2, %v4825_v53, %v3911_v24  ;;  %v631_v1 = vsel %vm601_vm2, %v4828_v27, %v3912_v14 }
 0x105   : > { %v1098_v7 = vsel %vm634_vm3, %v1066_v41, %v3906_v15  ;;  %v1099_v58 = vsel %vm634_vm3, %v1067_v37, %v3907_v13  ;;  %v3920_v32 = vpop.permute.xlu1 %3919  ;;  %v2479_v37 = vpack.c.bf16 %v3310_v2, %v3309_v22 }
 0x106   : > { %v1116_v39 = vpack.c.bf16 %v1099_v58, %v1098_v7  ;;  %v3915_v61 = vpop.permute.xlu0 %3914  ;;  %v3922_v5 = vunpack.i.h.bf16 %v3920_v32  ;;  %v3921_v10 = vunpack.i.l.bf16 %v3920_v32  ;;  %v3196_v58 = vld [vmem:[%s4250_s11 + $0x48] sm:$0xff]  ;;  %v3197_v32 = vld [vmem:[%s4250_s11 + $0x50] sm:$0xff] }
 0x107   : > { %v3917_v63 = vunpack.i.h.bf16 %v3915_v61  ;;  %v3916_v3 = vunpack.i.l.bf16 %v3915_v61  ;;  %v3195_v61 = vld [vmem:[%s4250_s11 + $0x38] sm:$0xff] }
 0x108   : > { %3461 = vmatprep.mubr.msk.bf16.mxu0 %vm1126_vm4, %v1116_v39  ;;  %v632_v42 = vsel %vm601_vm2, %v4854_v33, %v3921_v10  ;;  %v633_v21 = vsel %vm601_vm2, %v4857_v55, %v3922_v5  ;;  %v3194_v39 = vld [vmem:[%s4250_s11 + $0x30] sm:$0xff] }
 0x109   : > { %v1100_v9 = vsel %vm634_vm3, %v1068_v11, %v3916_v3  ;;  %v1101_v12 = vsel %vm634_vm3, %v1069_v47, %v3917_v63  ;;  %v3930_v50 = vpop.permute.xlu1 %3929  ;;  %v3311_v47 = vld [vmem:[%s4250_s11 + $0x31] sm:$0xff]  ;;  %v3312_v11 = vld [vmem:[%s4250_s11 + $0x39] sm:$0xff] }
 0x10a   : > { %v1117_v17 = vpack.c.bf16 %v1101_v12, %v1100_v9  ;;  %v3925_v35 = vpop.permute.xlu0 %3924  ;;  %v3932_v18 = vunpack.i.h.bf16 %v3930_v50  ;;  %v3931_v20 = vunpack.i.l.bf16 %v3930_v50  ;;  %v3313_v50 = vld [vmem:[%s4250_s11 + $0x49] sm:$0xff]  ;;  %v2480_v2 = vpack.c.bf16 %v3312_v11, %v3311_v47 }
 0x10b   : > { %v3927_v4 = vunpack.i.h.bf16 %v3925_v35  ;;  %v3926_v6 = vunpack.i.l.bf16 %v3925_v35 }
 0x10c   : > { %v665_v23 = vsel %vm634_vm3, %v632_v42, %v3931_v20  ;;  %v666_v29 = vsel %vm634_vm3, %v633_v21, %v3932_v18  ;;  %3462 = vmatmul.mubr.msk.bf16.gmra.mxu0 %vm1126_vm4, %v1117_v17  ;;  %v3314_v17 = vld [vmem:[%s4250_s11 + $0x51] sm:$0xff] }
 0x10d   : > { %v663_v57 = vsel %vm634_vm3, %v630_v0, %v3926_v6  ;;  %v664_v25 = vsel %vm634_vm3, %v631_v1, %v3927_v4  ;;  %v682_v30 = vpack.c.bf16 %v666_v29, %v665_v23  ;;  %v3940_v36 = vpop.permute.xlu1 %3939  ;;  %v2481_v23 = vpack.c.bf16 %v3314_v17, %v3313_v50 }
 0x10e   : > { %v681_v13 = vpack.c.bf16 %v664_v25, %v663_v57  ;;  %v3935_v15 = vpop.permute.xlu0 %3934  ;;  %v3942_v41 = vunpack.i.h.bf16 %v3940_v36  ;;  %v3941_v40 = vunpack.i.l.bf16 %v3940_v36  ;;  %v3198_v36 = vld [vmem:[%s4250_s11 + $0x60] sm:$0xff] }
 0x10f   : > { %v3937_v16 = vunpack.i.h.bf16 %v3935_v15  ;;  %v3936_v7 = vunpack.i.l.bf16 %v3935_v15 }
 0x110   : > { %3495 = vmatprep.mubr.msk.bf16.mxu1 %vm1126_vm4, %v681_v13  ;;  %v1913_v14 = vsel %vm601_vm2, %v3197_v32, %v3942_v41  ;;  %v1912_v24 = vsel %vm601_vm2, %v3196_v58, %v3941_v40  ;;  %v3199_v13 = vld [vmem:[%s4250_s11 + $0x68] sm:$0xff] }
 0x111   : > { %3496 = vmatmul.mubr.msk.bf16.gmra.mxu1 %vm1126_vm4, %v682_v30  ;;  %v3950_v63 = vpop.permute.xlu1 %3949  ;;  %v1911_v35 = vsel %vm601_vm2, %v3195_v61, %v3937_v16  ;;  %v1910_v18 = vsel %vm601_vm2, %v3194_v39, %v3936_v7  ;;  %v3315_v16 = vld [vmem:[%s4250_s11 + $0x61] sm:$0xff]  ;;  %v3316_v7 = vld [vmem:[%s4250_s11 + $0x69] sm:$0xff] }
 0x112   : > { %v3945_v3 = vpop.permute.xlu0 %3944  ;;  %v3952_v5 = vunpack.i.h.bf16 %v3950_v63  ;;  %v3951_v10 = vunpack.i.l.bf16 %v3950_v63  ;;  %3535 = vmatprep.mubr.msk.bf16.mxu1 %vm601_vm2, %v2479_v37  ;;  %v3317_v63 = vld [vmem:[%s4250_s11 + $0x79] sm:$0xff] }
 0x113   : > { %v3947_v9 = vunpack.i.h.bf16 %v3945_v3  ;;  %v3946_v12 = vunpack.i.l.bf16 %v3945_v3  ;;  %v3318_v3 = vld [vmem:[%s4250_s11 + $0x81] sm:$0xff] }
 0x114   : > { %v1944_v20 = vsel %vm634_vm3, %v1912_v24, %v3951_v10  ;;  %v1945_v42 = vsel %vm634_vm3, %v1913_v14, %v3952_v5  ;;  %v2483_v17 = vpack.c.bf16 %v3318_v3, %v3317_v63 }
 0x115   : > { %v1942_v21 = vsel %vm634_vm3, %v1910_v18, %v3946_v12  ;;  %v1943_v4 = vsel %vm634_vm3, %v1911_v35, %v3947_v9  ;;  %v1975_v6 = vpack.c.bf16 %v1945_v42, %v1944_v20  ;;  %v3960_v22 = vpop.permute.xlu1 %3959  ;;  %v2482_v12 = vpack.c.bf16 %v3316_v7, %v3315_v16 }
 0x116   : > { %v1974_v0 = vpack.c.bf16 %v1943_v4, %v1942_v21  ;;  %v3955_v1 = vpop.permute.xlu0 %3954  ;;  %v3962_v29 = vunpack.i.h.bf16 %v3960_v22  ;;  %v3961_v57 = vunpack.i.l.bf16 %v3960_v22 }
 0x117   : > { %v3957_v25 = vunpack.i.h.bf16 %v3955_v1  ;;  %v3956_v30 = vunpack.i.l.bf16 %v3955_v1 }
 0x118   : > { %3501 = vmatprep.mubr.msk.bf16.mxu0 %vm1126_vm4, %v1974_v0  ;;  %v1917_v58 = vsel %vm601_vm2, %v4615_v46, %v3962_v29  ;;  %v1916_v32 = vsel %vm601_vm2, %v4612_v38, %v3961_v57  ;;  %v3320_v0 = vld [vmem:[%s4250_s11 + $0x99] sm:$0xff] }
 0x119   : > { %3502 = vmatmul.mubr.msk.bf16.vlgmr.msra.gmra.mxu0 %vm1126_vm4, %v1975_v6  ;;  %3536 = vmatmul.mubr.msk.bf16.vlgmr.msra.gmra.mxu1 %vm601_vm2, %v2480_v2  ;;  %v3970_v15 = vpop.permute.xlu1 %3969  ;;  %v1915_v5 = vsel %vm601_vm2, %v3199_v13, %v3957_v25  ;;  %v1914_v10 = vsel %vm601_vm2, %v3198_v36, %v3956_v30  ;;  %v3319_v2 = vld [vmem:[%s4250_s11 + $0x91] sm:$0xff]  ;;  %v3321_v25 = vld [vmem:[%s4250_s11 + $0xa9] sm:$0xff] }
 0x11a   : > { %v3965_v37 = vpop.permute.xlu0 %3964  ;;  %v3972_v41 = vunpack.i.h.bf16 %v3970_v15  ;;  %v3971_v40 = vunpack.i.l.bf16 %v3970_v15  ;;  %3539 = vmatprep.mubr.msk.bf16.mxu1 %vm601_vm2, %v2481_v23  ;;  %v3322_v30 = vld [vmem:[%s4250_s11 + $0xb1] sm:$0xff]  ;;  %v2484_v16 = vpack.c.bf16 %v3320_v0, %v3319_v2 }
 0x11b   : > { %v3967_v39 = vunpack.i.h.bf16 %v3965_v37  ;;  %v3966_v61 = vunpack.i.l.bf16 %v3965_v37 }
 0x11c   : > { %v1948_v47 = vsel %vm634_vm3, %v1916_v32, %v3971_v40  ;;  %v1949_v11 = vsel %vm634_vm3, %v1917_v58, %v3972_v41  ;;  %v2485_v32 = vpack.c.bf16 %v3322_v30, %v3321_v25  ;;  %v3327_v25 = vld [vmem:[%s4250_s11 + $0xf1] sm:$0xff]  ;;  %v3328_v30 = vld [vmem:[%s4250_s11 + $0xf9] sm:$0xff] }
 0x11d   : > { %v1946_v14 = vsel %vm634_vm3, %v1914_v10, %v3966_v61  ;;  %v1947_v24 = vsel %vm634_vm3, %v1915_v5, %v3967_v39  ;;  %v1977_v46 = vpack.c.bf16 %v1949_v11, %v1948_v47  ;;  %v3980_v9 = vpop.permute.xlu1 %3979  ;;  %v3323_v47 = vld [vmem:[%s4250_s11 + $0xc1] sm:$0xff]  ;;  %v3324_v11 = vld [vmem:[%s4250_s11 + $0xc9] sm:$0xff] }
 0x11e   : > { %v1976_v38 = vpack.c.bf16 %v1947_v24, %v1946_v14  ;;  %v3975_v50 = vpop.permute.xlu0 %3974  ;;  %v3982_v35 = vunpack.i.h.bf16 %v3980_v9  ;;  %v3981_v18 = vunpack.i.l.bf16 %v3980_v9 }
 0x11f   : > { %v3977_v20 = vunpack.i.h.bf16 %v3975_v50  ;;  %v3976_v42 = vunpack.i.l.bf16 %v3975_v50 }
 0x120   : > { %3505 = vmatprep.mubr.msk.bf16.mxu0 %vm1126_vm4, %v1976_v38  ;;  %v1921_v1 = vsel %vm601_vm2, %v4671_v43, %v3982_v35  ;;  %v1920_v23 = vsel %vm601_vm2, %v4668_v62, %v3981_v18  ;;  %v3326_v38 = vld [vmem:[%s4250_s11 + $0xe1] sm:$0xff] }
 0x121   : > { %3506 = vmatmul.mubr.msk.bf16.gmra.mxu0 %vm1126_vm4, %v1977_v46  ;;  %3540 = vmatmul.mubr.msk.bf16.gmra.mxu1 %vm601_vm2, %v2482_v12  ;;  %v3990_v21 = vpop.permute.xlu1 %3989  ;;  %v1919_v36 = vsel %vm601_vm2, %v4630_v60, %v3977_v20  ;;  %v1918_v13 = vsel %vm601_vm2, %v4627_v59, %v3976_v42  ;;  %v3325_v12 = vld [vmem:[%s4250_s11 + $0xd9] sm:$0xff] }
 0x122   : > { %v3985_v4 = vpop.permute.xlu0 %3984  ;;  %v3992_v6 = vunpack.i.h.bf16 %v3990_v21  ;;  %v3991_v22 = vunpack.i.l.bf16 %v3990_v21  ;;  %3543 = vmatprep.mubr.msk.bf16.mxu1 %vm601_vm2, %v2483_v17  ;;  %v2486_v21 = vpack.c.bf16 %v3324_v11, %v3323_v47 }
 0x123   : > { %v3987_v29 = vunpack.i.h.bf16 %v3985_v4  ;;  %v3986_v57 = vunpack.i.l.bf16 %v3985_v4 }
 0x124   : > { %v1952_v15 = vsel %vm634_vm3, %v1920_v23, %v3991_v22  ;;  %v1953_v37 = vsel %vm634_vm3, %v1921_v1, %v3992_v6  ;;  %v2487_v22 = vpack.c.bf16 %v3326_v38, %v3325_v12 }
 0x125   : > { %v1950_v41 = vsel %vm634_vm3, %v1918_v13, %v3986_v57  ;;  %v1951_v43 = vsel %vm634_vm3, %v1919_v36, %v3987_v29  ;;  %v1979_v40 = vpack.c.bf16 %v1953_v37, %v1952_v15  ;;  %v4000_v62 = vpop.permute.xlu1 %3999 }
 0x126   : > { %v1978_v7 = vpack.c.bf16 %v1951_v43, %v1950_v41  ;;  %v3995_v58 = vpop.permute.xlu0 %3994  ;;  %v4002_v60 = vunpack.i.h.bf16 %v4000_v62  ;;  %v4001_v39 = vunpack.i.l.bf16 %v4000_v62  ;;  %v3329_v41 = vld [vmem:[%s4250_s11 + $0x109] sm:$0xff]  ;;  %v3330_v43 = vld [vmem:[%s4250_s11 + $0x111] sm:$0xff] }
 0x127   : > { %v3997_v61 = vunpack.i.h.bf16 %v3995_v58  ;;  %v3996_v59 = vunpack.i.l.bf16 %v3995_v58 }
 0x128   : > { %3509 = vmatprep.mubr.msk.bf16.mxu0 %vm1126_vm4, %v1978_v7  ;;  %v1925_v14 = vsel %vm601_vm2, %v4731_v56, %v4002_v60  ;;  %v1924_v24 = vsel %vm601_vm2, %v4728_v51, %v4001_v39  ;;  %v2488_v60 = vpack.c.bf16 %v3328_v30, %v3327_v25 }
 0x129   : > { %3510 = vmatmul.mubr.msk.bf16.gmra.mxu0 %vm1126_vm4, %v1979_v40  ;;  %3544 = vmatmul.mubr.msk.bf16.gmra.mxu1 %vm601_vm2, %v2484_v16  ;;  %v4010_v63 = vpop.permute.xlu1 %4009  ;;  %v1923_v50 = vsel %vm601_vm2, %v4686_v45, %v3997_v61  ;;  %v1922_v17 = vsel %vm601_vm2, %v4683_v54, %v3996_v59  ;;  %v2489_v59 = vpack.c.bf16 %v3330_v43, %v3329_v41 }
 0x12a   : > { %v4005_v3 = vpop.permute.xlu0 %4004  ;;  %v4012_v5 = vunpack.i.h.bf16 %v4010_v63  ;;  %v4011_v10 = vunpack.i.l.bf16 %v4010_v63  ;;  %3547 = vmatprep.mubr.msk.bf16.mxu1 %vm601_vm2, %v2485_v32 }
 0x12b   : > { %v4007_v46 = vunpack.i.h.bf16 %v4005_v3  ;;  %v4006_v9 = vunpack.i.l.bf16 %v4005_v3 }
 0x12c   : > { %v1956_v35 = vsel %vm634_vm3, %v1924_v24, %v4011_v10  ;;  %v1957_v18 = vsel %vm634_vm3, %v1925_v14, %v4012_v5  ;;  %v3331_v14 = vld [vmem:[%s4250_s11 + $0x121] sm:$0xff]  ;;  %v3332_v24 = vld [vmem:[%s4250_s11 + $0x129] sm:$0xff] }
 0x12d   : > { %v1954_v20 = vsel %vm634_vm3, %v1922_v17, %v4006_v9  ;;  %v1955_v56 = vsel %vm634_vm3, %v1923_v50, %v4007_v46  ;;  %v1981_v42 = vpack.c.bf16 %v1957_v18, %v1956_v35  ;;  %v4020_v51 = vpop.permute.xlu1 %4019  ;;  %v3333_v50 = vld [vmem:[%s4250_s11 + $0x139] sm:$0xff]  ;;  %v3334_v17 = vld [vmem:[%s4250_s11 + $0x141] sm:$0xff] }
 0x12e   : > { %v1980_v4 = vpack.c.bf16 %v1955_v56, %v1954_v20  ;;  %v4015_v6 = vpop.permute.xlu0 %4014  ;;  %v4022_v45 = vunpack.i.h.bf16 %v4020_v51  ;;  %v4021_v2 = vunpack.i.l.bf16 %v4020_v51 }
 0x12f   : > { %v4017_v0 = vunpack.i.h.bf16 %v4015_v6  ;;  %v4016_v54 = vunpack.i.l.bf16 %v4015_v6 }
 0x130   : > { %3513 = vmatprep.mubr.msk.bf16.mxu0 %vm1126_vm4, %v1980_v4  ;;  %v1929_v36 = vsel %vm601_vm2, %v4777_v26, %v4022_v45  ;;  %v1928_v13 = vsel %vm601_vm2, %v4774_v34, %v4021_v2 }
 0x131   : > { %3514 = vmatmul.mubr.msk.bf16.gmra.mxu0 %vm1126_vm4, %v1981_v42  ;;  %3548 = vmatmul.mubr.msk.bf16.gmra.mxu1 %vm601_vm2, %v2486_v21  ;;  %v4030_v1 = vpop.permute.xlu1 %4029  ;;  %v1927_v40 = vsel %vm601_vm2, %v4745_v52, %v4017_v0  ;;  %v1926_v62 = vsel %vm601_vm2, %v4742_v49, %v4016_v54  ;;  %v2490_v21 = vpack.c.bf16 %v3332_v24, %v3331_v14 }
 0x132   : > { %v4025_v23 = vpop.permute.xlu0 %4024  ;;  %v4032_v29 = vunpack.i.h.bf16 %v4030_v1  ;;  %v4031_v57 = vunpack.i.l.bf16 %v4030_v1  ;;  %3551 = vmatprep.mubr.msk.bf16.mxu1 %vm601_vm2, %v2487_v22  ;;  %v2491_v22 = vpack.c.bf16 %v3334_v17, %v3333_v50 }
 0x133   : > { %v4027_v15 = vunpack.i.h.bf16 %v4025_v23  ;;  %v4026_v37 = vunpack.i.l.bf16 %v4025_v23 }
 0x134   : > { %v1960_v16 = vsel %vm634_vm3, %v1928_v13, %v4031_v57  ;;  %v1961_v7 = vsel %vm634_vm3, %v1929_v36, %v4032_v29  ;;  %v3335_v29 = vld [vmem:[%s4250_s11 + $0x151] sm:$0xff]  ;;  %v3336_v57 = vld [vmem:[%s4250_s11 + $0x159] sm:$0xff] }
 0x135   : > { %v1958_v58 = vsel %vm634_vm3, %v1926_v62, %v4026_v37  ;;  %v1959_v26 = vsel %vm634_vm3, %v1927_v40, %v4027_v15  ;;  %v1983_v32 = vpack.c.bf16 %v1961_v7, %v1960_v16  ;;  %v4040_v34 = vpop.permute.xlu1 %4039  ;;  %v3337_v15 = vld [vmem:[%s4250_s11 + $0x169] sm:$0xff]  ;;  %v3338_v37 = vld [vmem:[%s4250_s11 + $0x171] sm:$0xff] }
 0x136   : > { %v1982_v39 = vpack.c.bf16 %v1959_v26, %v1958_v58  ;;  %v4035_v61 = vpop.permute.xlu0 %4034  ;;  %v4042_v52 = vunpack.i.h.bf16 %v4040_v34  ;;  %v4041_v63 = vunpack.i.l.bf16 %v4040_v34  ;;  %v2492_v58 = vpack.c.bf16 %v3336_v57, %v3335_v29 }
 0x137   : > { %v4037_v3 = vunpack.i.h.bf16 %v4035_v61  ;;  %v4036_v49 = vunpack.i.l.bf16 %v4035_v61  ;;  %v3224_v61 = vld [vmem:[%s4250_s11 + $0x198] sm:$0xff] }
 0x138   : > { %3517 = vmatprep.mubr.msk.bf16.mxu0 %vm1126_vm4, %v1982_v39  ;;  %v1933_v46 = vsel %vm601_vm2, %v4817_v31, %v4042_v52  ;;  %v1932_v9 = vsel %vm601_vm2, %v4814_v48, %v4041_v63 }
 0x139   : > { %3518 = vmatmul.mubr.msk.bf16.gmra.mxu0 %vm1126_vm4, %v1983_v32  ;;  %3552 = vmatmul.mubr.msk.bf16.gmra.mxu1 %vm601_vm2, %v2488_v60  ;;  %v4050_v5 = vpop.permute.xlu1 %4049  ;;  %v1931_v35 = vsel %vm601_vm2, %v4788_v28, %v4037_v3  ;;  %v1930_v18 = vsel %vm601_vm2, %v4785_v44, %v4036_v49 }
 0x13a   : > { %v4045_v10 = vpop.permute.xlu0 %4044  ;;  %v4052_v47 = vunpack.i.h.bf16 %v4050_v5  ;;  %v4051_v11 = vunpack.i.l.bf16 %v4050_v5  ;;  %3555 = vmatprep.mubr.msk.bf16.mxu1 %vm601_vm2, %v2489_v59  ;;  %v3225_v59 = vld [vmem:[%s4250_s11 + $0x1a0] sm:$0xff] }
 0x13b   : > { %v4047_v12 = vunpack.i.h.bf16 %v4045_v10  ;;  %v4046_v38 = vunpack.i.l.bf16 %v4045_v10  ;;  %v3339_v5 = vld [vmem:[%s4250_s11 + $0x181] sm:$0xff]  ;;  %v3340_v10 = vld [vmem:[%s4250_s11 + $0x189] sm:$0xff]  ;;  %s230_s11 = sand.u32 1, %s4148_s19  }
 0x13c   : > { %v1964_v20 = vsel %vm634_vm3, %v1932_v9, %v4051_v11  ;;  %v1965_v56 = vsel %vm634_vm3, %v1933_v46, %v4052_v47  ;;  %s3056_s12 = sshll.u32 %s230_s11, 2  ;;  %s2924_s22 = scalar_lea.sflag [#allocation3], %s230_s11 }
 0x13d   : > { %v1962_v42 = vsel %vm634_vm3, %v1930_v18, %v4046_v38  ;;  %v1963_v31 = vsel %vm634_vm3, %v1931_v35, %v4047_v12  ;;  %v1985_v51 = vpack.c.bf16 %v1965_v56, %v1964_v20  ;;  %v4060_v48 = vpop.permute.xlu1 %4059  ;;  %v2494_v18 = vpack.c.bf16 %v3340_v10, %v3339_v5  ;;  %s232_s14 = scalar_lea.vmem [#allocation2], %s3056_s12 }
 0x13e   : > { %v1984_v4 = vpack.c.bf16 %v1963_v31, %v1962_v42  ;;  %v4055_v6 = vpop.permute.xlu0 %4054  ;;  %v4062_v28 = vunpack.i.h.bf16 %v4060_v48  ;;  %v4061_v45 = vunpack.i.l.bf16 %v4060_v48  ;;  %s2943_s15 = sshll.u32 %s232_s14, 4  ;;  %s2944_s15 = int_to_ptr.vmem [resolvable:$true] %s2943_s15 }
 0x13f   : > { %v4057_v2 = vunpack.i.h.bf16 %v4055_v6  ;;  %v4056_v44 = vunpack.i.l.bf16 %v4055_v6  ;;  %s4096_s25 = scalar_lea.vmem %s2944_s15, 64  ;;  %p4103_p0 = scmp.lt.s32.totalorder %s2944_s15, %s4101_s6 }
 0x140   : > { %3521 = vmatprep.mubr.msk.bf16.mxu0 %vm1126_vm4, %v1984_v4  ;;  %v1937_v25 = vsel %vm601_vm2, %v4857_v55, %v4062_v28  ;;  %v1936_v30 = vsel %vm601_vm2, %v4854_v33, %v4061_v45  ;;  %p4097_p11 = scmp.ne.s32.totalorder %s2944_s15, %s4096_s25  ;;  %p4104_p1 = scmp.lt.s32.totalorder %s4102_s7, %s4096_s25 }
 0x141   : > { %3522 = vmatmul.mubr.msk.bf16.gmra.mxu0 %vm1126_vm4, %v1985_v51  ;;  %3556 = vmatmul.mubr.msk.bf16.gmra.mxu1 %vm601_vm2, %v2490_v21  ;;  %v4070_v0 = vpop.permute.xlu1 %4069  ;;  %v1935_v41 = vsel %vm601_vm2, %v4828_v27, %v4057_v2  ;;  %v1934_v43 = vsel %vm601_vm2, %v4825_v53, %v4056_v44  ;;  %v2493_v27 = vpack.c.bf16 %v3338_v37, %v3337_v15 }
 0x142   : > { %v4065_v54 = vpop.permute.xlu0 %4064  ;;  %v4072_v1 = vunpack.i.h.bf16 %v4070_v0  ;;  %v4071_v23 = vunpack.i.l.bf16 %v4070_v0  ;;  %3559 = vmatprep.mubr.msk.bf16.mxu1 %vm601_vm2, %v2491_v22  ;;  %p4098_p12 = pnand %p4097_p11, %p4229_p5  ;;  %p4105_p2 = por %p4104_p1, %p4103_p0 }
 0x143   : > { %v4067_v36 = vunpack.i.h.bf16 %v4065_v54  ;;  %v4066_v13 = vunpack.i.l.bf16 %v4065_v54 }
 0x144   : > { %v1968_v40 = vsel %vm634_vm3, %v1936_v30, %v4071_v23  ;;  %v1969_v62 = vsel %vm634_vm3, %v1937_v25, %v4072_v1  ;;  %p4099_p13 = pneg %p4098_p12 }
 0x145   : > { %v1966_v55 = vsel %vm634_vm3, %v1934_v43, %v4066_v13  ;;  %v1967_v33 = vsel %vm634_vm3, %v1935_v41, %v4067_v36  ;;  %v1987_v16 = vpack.c.bf16 %v1969_v62, %v1968_v40  ;;  %v4080_v7 = vpop.permute.xlu1 %4079 }
 0x146   : > { %v1986_v26 = vpack.c.bf16 %v1967_v33, %v1966_v55  ;;  %v4075_v32 = vpop.permute.xlu0 %4074  ;;  %v4082_v34 = vunpack.i.h.bf16 %v4080_v7  ;;  %v4081_v60 = vunpack.i.l.bf16 %v4080_v7  ;;  %p4106_p3 = pnand %p4105_p2, %p4099_p13 }
 0x147   : > { %v4077_v53 = vunpack.i.h.bf16 %v4075_v32  ;;  %v4076_v39 = vunpack.i.l.bf16 %v4075_v32 }
 0x148   : > { %3525 = vmatprep.mubr.msk.bf16.mxu0 %vm1126_vm4, %v1986_v26  ;;  %v1941_v47 = vsel %vm601_vm2, %v3225_v59, %v4082_v34  ;;  %v1940_v11 = vsel %vm601_vm2, %v3224_v61, %v4081_v60 }
 0x149   : > { %3526 = vmatmul.mubr.msk.bf16.gmra.mxu0 %vm1126_vm4, %v1987_v16  ;;  %3560 = vmatmul.mubr.msk.bf16.gmra.mxu1 %vm601_vm2, %v2492_v58  ;;  %v4090_v52 = vpop.permute.xlu1 %4089  ;;  %v1939_v46 = vsel %vm601_vm2, %v4868_v8, %v4077_v53  ;;  %v1938_v9 = vsel %vm601_vm2, %v4865_v19, %v4076_v39 }
 0x14a   : > { %v4085_v63 = vpop.permute.xlu0 %4084  ;;  %v4092_v3 = vunpack.i.h.bf16 %v4090_v52  ;;  %v4091_v49 = vunpack.i.l.bf16 %v4090_v52  ;;  %3563 = vmatprep.mubr.msk.bf16.mxu1 %vm601_vm2, %v2493_v27 }
 0x14b   : > { %v4087_v14 = vunpack.i.h.bf16 %v4085_v63  ;;  %v4086_v24 = vunpack.i.l.bf16 %v4085_v63 }
 0x14c   : > { %v1972_v12 = vsel %vm634_vm3, %v1940_v11, %v4091_v49  ;;  %v1973_v38 = vsel %vm634_vm3, %v1941_v47, %v4092_v3 }
 0x14d   : > { %v1970_v50 = vsel %vm634_vm3, %v1938_v9, %v4086_v24  ;;  %v1971_v17 = vsel %vm634_vm3, %v1939_v46, %v4087_v14  ;;  %v1989_v35 = vpack.c.bf16 %v1973_v38, %v1972_v12 }
 0x14e   : > { %v1988_v20 = vpack.c.bf16 %v1971_v17, %v1970_v50 }
 0x150   : > { %3529 = vmatprep.mubr.msk.bf16.mxu0 %vm1126_vm4, %v1988_v20 }
 0x151   : > { %3530 = vmatmul.mubr.msk.bf16.gmra.mxu0 %vm1126_vm4, %v1989_v35  ;;  %3564 = vmatmul.mubr.msk.bf16.gmra.mxu1 %vm601_vm2, %v2494_v18 }
 0x15c   : > { %v5054_v8 = vpop.f32.mrf.mxu0 }
 0x15e   : > { %v5056_v19 = vpop.f32.mrf.mxu0 }
 0x160   : > { %v5060_v42 = vpop.f32.mrf.mxu0 }
 0x161   : > { %v5058_v56 = vpop.f32.mrf.mxu1 }
 0x162   : > { %v5064_v51 = vpop.f32.mrf.mxu0 }
 0x163   : > { %v5062_v31 = vpop.f32.mrf.mxu1 }
 0x165   : > { %v5066_v48 = vpop.f32.mrf.mxu1 }
 0x167   : > { %v5070_v4 = vpop.f32.mrf.mxu1 }
 0x16c   : > { %v5068_v21 = vpop.f32.mrf.mxu0 }
 0x16e   : > { %v1229_v6 = vpop.f32.mrf.mxu0 }
 0x170   : > { %v3440_v28 = vpop.f32.mrf.mxu0 }
 0x171   : > { %v5072_v22 = vpop.f32.mrf.mxu1 }
 0x172   : > { %v1232_v54 = vpop.f32.mrf.mxu0 }
 0x173   : > { %v1446_v45 = vpop.f32.mrf.mxu1 }
 0x174   : > { %v5074_v2 = vadd.f32 %v1446_v45, %v1229_v6 }
 0x175   : > { %v3474_v44 = vpop.f32.mrf.mxu1 }
 0x176   : > { %v5076_v0 = vadd.f32 %v3474_v44, %v3440_v28 }
 0x177   : > { %v1449_v1 = vpop.f32.mrf.mxu1 }
 0x178   : > { %v5078_v23 = vadd.f32 %v1449_v1, %v1232_v54 }
 0x17c   : > { %v3443_v29 = vpop.f32.mrf.mxu0 }
 0x17e   : > { %v1245_v57 = vpop.f32.mrf.mxu0 }
 0x180   : > { %v3444_v36 = vpop.f32.mrf.mxu0 }
 0x181   : > { %v3477_v25 = vpop.f32.mrf.mxu1 }
 0x182   : > { %v5080_v30 = vadd.f32 %v3477_v25, %v3443_v29  ;;  %v1248_v43 = vpop.f32.mrf.mxu0 }
 0x183   : > { %v1462_v13 = vpop.f32.mrf.mxu1 }
 0x184   : > { %v5082_v15 = vadd.f32 %v1462_v13, %v1245_v57 }
 0x185   : > { %v3478_v37 = vpop.f32.mrf.mxu1 }
 0x186   : > { %v5084_v41 = vadd.f32 %v3478_v37, %v3444_v36 }
 0x187   : > { %v1465_v40 = vpop.f32.mrf.mxu1 }
 0x188   : > { %v5086_v62 = vadd.f32 %v1465_v40, %v1248_v43 }
 0x18c   : > { %v3447_v55 = vpop.f32.mrf.mxu0 }
 0x18e   : > { %v1261_v33 = vpop.f32.mrf.mxu0 }
 0x190   : > { %v3448_v58 = vpop.f32.mrf.mxu0 }
 0x191   : > { %v3481_v16 = vpop.f32.mrf.mxu1 }
 0x192   : > { %v5088_v7 = vadd.f32 %v3481_v16, %v3447_v55  ;;  %v1264_v60 = vpop.f32.mrf.mxu0 }
 0x193   : > { %v1478_v26 = vpop.f32.mrf.mxu1 }
 0x194   : > { %v5090_v32 = vadd.f32 %v1478_v26, %v1261_v33 }
 0x195   : > { %v3482_v27 = vpop.f32.mrf.mxu1 }
 0x196   : > { %v5092_v34 = vadd.f32 %v3482_v27, %v3448_v58 }
 0x197   : > { %v1481_v53 = vpop.f32.mrf.mxu1 }
 0x198   : > { %v5094_v39 = vadd.f32 %v1481_v53, %v1264_v60 }
 0x19c   : > { %v3451_v61 = vpop.f32.mrf.mxu0 }
 0x19e   : > { %v1277_v59 = vpop.f32.mrf.mxu0 }
 0x1a0   : > { %v3452_v3 = vpop.f32.mrf.mxu0 }
 0x1a1   : > { %v3485_v52 = vpop.f32.mrf.mxu1 }
 0x1a2   : > { %v5096_v63 = vadd.f32 %v3485_v52, %v3451_v61  ;;  %v1280_v11 = vpop.f32.mrf.mxu0 }
 0x1a3   : > { %v1494_v49 = vpop.f32.mrf.mxu1 }
 0x1a4   : > { %v5098_v5 = vadd.f32 %v1494_v49, %v1277_v59  ;;  %v1439_v49 = vadd.f32 %v5058_v56, %v5054_v8 }
 0x1a5   : > { %v3486_v10 = vpop.f32.mrf.mxu1 }
 0x1a6   : > { %v5100_v47 = vadd.f32 %v3486_v10, %v3452_v3 }
 0x1a7   : > { %v1497_v14 = vpop.f32.mrf.mxu1 }
 0x1a8   : > { %v5102_v24 = vadd.f32 %v1497_v14, %v1280_v11 }
 0x1ac   : > { %v3455_v46 = vpop.f32.mrf.mxu0 }
 0x1ae   : > { %v1293_v9 = vpop.f32.mrf.mxu0 }
 0x1b0   : > { %v3456_v50 = vpop.f32.mrf.mxu0 }
 0x1b1   : > { %v3489_v12 = vpop.f32.mrf.mxu1 }
 0x1b2   : > { %v5104_v38 = vadd.f32 %v3489_v12, %v3455_v46  ;;  %v1296_v6 = vpop.f32.mrf.mxu0  ;;  %v1431_v46 = vadd.f32 %v5062_v31, %v5056_v19  ;;  %v1434_v31 = vadd.f32 %v5070_v4, %v5064_v51 }
 0x1b3   : > { %v1510_v17 = vpop.f32.mrf.mxu1 }
 0x1b4   : > { %v5106_v35 = vadd.f32 %v1510_v17, %v1293_v9 }
 0x1b5   : > { %v3490_v18 = vpop.f32.mrf.mxu1 }
 0x1b6   : > { %v5108_v20 = vadd.f32 %v3490_v18, %v3456_v50  ;;  %v1442_v50 = vadd.f32 %v5066_v48, %v5060_v42 }
 0x1b7   : > { %v1513_v28 = vpop.f32.mrf.mxu1 }
 0x1b8   : > { %v5110_v45 = vadd.f32 %v1513_v28, %v1296_v6 }
 0x1bc   : > { %v3459_v44 = vpop.f32.mrf.mxu0 }
 0x1be   : > { %v1309_v54 = vpop.f32.mrf.mxu0 }
 0x1c0   : > { %v3460_v57 = vpop.f32.mrf.mxu0 }
 0x1c1   : > { %v3493_v1 = vpop.f32.mrf.mxu1 }
 0x1c2   : > { %v5112_v29 = vadd.f32 %v3493_v1, %v3459_v44  ;;  %v1312_v43 = vpop.f32.mrf.mxu0  ;;  %v1455_v44 = vadd.f32 %v5072_v22, %v5068_v21 }
 0x1c3   : > { %v1526_v25 = vpop.f32.mrf.mxu1 }
 0x1c4   : > { %v5114_v36 = vadd.f32 %v1526_v25, %v1309_v54 }
 0x1c5   : > { %v3494_v13 = vpop.f32.mrf.mxu1 }
 0x1c6   : > { %v5116_v37 = vadd.f32 %v3494_v13, %v3460_v57 }
 0x1c7   : > { %v1529_v40 = vpop.f32.mrf.mxu1 }
 0x1c8   : > { %v5118_v55 = vadd.f32 %v1529_v40, %v1312_v43 }
 0x1cc   : > { %v3463_v33 = vpop.f32.mrf.mxu0 }
 0x1ce   : > { %v1325_v16 = vpop.f32.mrf.mxu0 }
 0x1d0   : > { %v3464_v27 = vpop.f32.mrf.mxu0 }
 0x1d1   : > { %v3497_v58 = vpop.f32.mrf.mxu1 }
 0x1d2   : > { %v5120_v26 = vadd.f32 %v3497_v58, %v3463_v33  ;;  %v1328_v52 = vpop.f32.mrf.mxu0 }
 0x1d3   : > { %v1542_v60 = vpop.f32.mrf.mxu1 }
 0x1d4   : > { %v5122_v53 = vadd.f32 %v1542_v60, %v1325_v16 }
 0x1d5   : > { %v3498_v61 = vpop.f32.mrf.mxu1 }
 0x1d6   : > { %v5125_v59 = vadd.f32 %v3498_v61, %v3464_v27 }
 0x1d7   : > { %v1545_v3 = vpop.f32.mrf.mxu1 }
 0x1d8   : > { %v5134_v10 = vadd.f32 %v1545_v3, %v1328_v52 }
 0x1d9   : > { %v3503_v11 = vpop.f32.mrf.mxu0  ;;  %v3537_v14 = vpop.f32.mrf.mxu1 }
 0x1da   : > { %v2212_v9 = vadd.f32 %v3503_v11, %v1439_v49  ;;  %2711 = vst.msk [vmem:[%s5130_s8 + $0x10] sm:$0xff] %vm634_vm3, %v3537_v14  ;;  %v2813_v12 = vmul.f32 %v3537_v14, %v3537_v14  ;;  %v2744_v1 = vsel %vm634_vm3, %v3537_v14, 0.0 }
 0x1db   : > { %v2083_v8 = vpop.f32.mrf.mxu0  ;;  %v2582_v56 = vpop.f32.mrf.mxu1 }
 0x1dc   : > { %2244 = vst.msk [vmem:[%s5139_s30 + $0x10] sm:$0xff] %vm634_vm3, %v2212_v9  ;;  %v2347_v17 = vmul.f32 %v2212_v9, %v2212_v9  ;;  %v2210_v18 = vadd.f32 %v2083_v8, %v1431_v46  ;;  %2709 = vst.msk [vmem:[%s5130_s8] sm:$0xff] %vm634_vm3, %v2582_v56  ;;  %v2811_v6 = vmul.f32 %v2582_v56, %v2582_v56  ;;  %v2277_v54 = vsel %vm634_vm3, %v2212_v9, 0.0 }
 0x1dd   : > { %v3504_v28 = vpop.f32.mrf.mxu0  ;;  %v3538_v19 = vpop.f32.mrf.mxu1  ;;  %v2846_v57 = vsel %vm634_vm3, %v2813_v12, 0.0  ;;  %v2741_v25 = vsel %vm634_vm3, %v2582_v56, 0.0 }
 0x1de   : > { %2242 = vst.msk [vmem:[%s5139_s30] sm:$0xff] %vm634_vm3, %v2210_v18  ;;  %v2345_v42 = vmul.f32 %v2210_v18, %v2210_v18  ;;  %v2213_v48 = vadd.f32 %v3504_v28, %v1442_v50  ;;  %2712 = vst.msk [vmem:[%s5130_s8 + $0x18] sm:$0xff] %vm634_vm3, %v3538_v19  ;;  %v2380_v21 = vsel %vm634_vm3, %v2347_v17, 0.0  ;;  %v2274_v22 = vsel %vm634_vm3, %v2210_v18, 0.0 }
 0x1df   : > { %v2086_v51 = vpop.f32.mrf.mxu0  ;;  %v2585_v4 = vpop.f32.mrf.mxu1  ;;  %v2843_v13 = vsel %vm634_vm3, %v2811_v6, 0.0  ;;  %v2746_v40 = vsel %vm634_vm3, %v3538_v19, 0.0  ;;  %v2814_v33 = vmul.f32 %v3538_v19, %v3538_v19 }
 0x1e0   : > { %2245 = vst.msk [vmem:[%s5139_s30 + $0x18] sm:$0xff] %vm634_vm3, %v2213_v48  ;;  %v2211_v43 = vadd.f32 %v2086_v51, %v1434_v31  ;;  %2710 = vst.msk [vmem:[%s5130_s8 + $0x8] sm:$0xff] %vm634_vm3, %v2585_v4  ;;  %v2742_v16 = vsel %vm634_vm3, %v2585_v4, 0.0  ;;  %v2812_v58 = vmul.f32 %v2585_v4, %v2585_v4  ;;  %v2377_v61 = vsel %vm634_vm3, %v2345_v42, 0.0 }
 0x1e1   : > { %v3507_v27 = vpop.f32.mrf.mxu0  ;;  %v3541_v60 = vpop.f32.mrf.mxu1  ;;  %v2743_v49 = vadd.f32 %v2742_v16, %v2741_v25  ;;  %v2348_v11 = vmul.f32 %v2213_v48, %v2213_v48  ;;  %v2279_v56 = vsel %vm634_vm3, %v2213_v48, 0.0  ;;  %v2848_v6 = vsel %vm634_vm3, %v2814_v33, 0.0 }
 0x1e2   : > { %2243 = vst.msk [vmem:[%s5139_s30 + $0x8] sm:$0xff] %vm634_vm3, %v2211_v43  ;;  %v2275_v52 = vsel %vm634_vm3, %v2211_v43, 0.0  ;;  %v2346_v3 = vmul.f32 %v2211_v43, %v2211_v43  ;;  %2715 = vst.msk [vmem:[%s5130_s8 + $0x30] sm:$0xff] %vm634_vm3, %v3541_v60  ;;  %v2844_v46 = vsel %vm634_vm3, %v2812_v58, 0.0  ;;  %v2216_v9 = vadd.f32 %v3507_v27, %v1455_v44 }
 0x1e3   : > { %v2276_v14 = vadd.f32 %v2275_v52, %v2274_v22  ;;  %v2099_v12 = vpop.f32.mrf.mxu0  ;;  %v2598_v8 = vpop.f32.mrf.mxu1  ;;  %v2745_v17 = vadd.f32 %v2744_v1, %v2743_v49  ;;  %v2845_v18 = vadd.f32 %v2844_v46, %v2843_v13  ;;  %v2817_v31 = vmul.f32 %v3541_v60, %v3541_v60 }
 0x1e4   : > { %v2378_v50 = vsel %vm634_vm3, %v2346_v3, 0.0  ;;  %2713 = vst.msk [vmem:[%s5130_s8 + $0x20] sm:$0xff] %vm634_vm3, %v2598_v8  ;;  %2248 = vst.msk [vmem:[%s5139_s30 + $0x30] sm:$0xff] %vm634_vm3, %v2216_v9  ;;  %v2351_v48 = vmul.f32 %v2216_v9, %v2216_v9  ;;  %v2214_v51 = vadd.f32 %v2099_v12, %v5074_v2  ;;  %v2382_v1 = vsel %vm634_vm3, %v2348_v11, 0.0 }
 0x1e5   : > { %v2278_v28 = vadd.f32 %v2277_v54, %v2276_v14  ;;  %v2379_v19 = vadd.f32 %v2378_v50, %v2377_v61  ;;  %v3508_v44 = vpop.f32.mrf.mxu0  ;;  %v3542_v42 = vpop.f32.mrf.mxu1  ;;  %v2847_v25 = vadd.f32 %v2846_v57, %v2845_v18  ;;  %v2747_v4 = vadd.f32 %v2746_v40, %v2745_v17 }
 0x1e6   : > { %2716 = vst.msk [vmem:[%s5130_s8 + $0x38] sm:$0xff] %vm634_vm3, %v3542_v42  ;;  %v2752_v54 = vsel %vm634_vm3, %v3541_v60, 0.0  ;;  %v2285_v16 = vsel %vm634_vm3, %v2216_v9, 0.0  ;;  %2246 = vst.msk [vmem:[%s5139_s30 + $0x20] sm:$0xff] %vm634_vm3, %v2214_v51  ;;  %v2349_v57 = vmul.f32 %v2214_v51, %v2214_v51  ;;  %v2748_v58 = vsel %vm634_vm3, %v2598_v8, 0.0 }
 0x1e7   : > { %v2381_v22 = vadd.f32 %v2380_v21, %v2379_v19  ;;  %v2280_v13 = vadd.f32 %v2279_v56, %v2278_v28  ;;  %v2102_v43 = vpop.f32.mrf.mxu0  ;;  %v2601_v33 = vpop.f32.mrf.mxu1  ;;  %v2815_v2 = vmul.f32 %v2598_v8, %v2598_v8  ;;  %v2749_v27 = vadd.f32 %v2748_v58, %v2747_v4 }
 0x1e8   : > { %2714 = vst.msk [vmem:[%s5130_s8 + $0x28] sm:$0xff] %vm634_vm3, %v2601_v33  ;;  %v2849_v21 = vadd.f32 %v2848_v6, %v2847_v25  ;;  %v2217_v60 = vadd.f32 %v3508_v44, %v5076_v0  ;;  %v2388_v3 = vsel %vm634_vm3, %v2351_v48, 0.0  ;;  %v2854_v49 = vsel %vm634_vm3, %v2817_v31, 0.0 }
 0x1e9   : > { %v2383_v40 = vadd.f32 %v2382_v1, %v2381_v22  ;;  %v3511_v61 = vpop.f32.mrf.mxu0  ;;  %v3545_v52 = vpop.f32.mrf.mxu1  ;;  %v2281_v11 = vsel %vm634_vm3, %v2214_v51, 0.0  ;;  %v2850_v14 = vsel %vm634_vm3, %v2815_v2, 0.0  ;;  %v2384_v9 = vsel %vm634_vm3, %v2349_v57, 0.0 }
 0x1ea   : > { %2719 = vst.msk [vmem:[%s5130_s8 + $0x50] sm:$0xff] %vm634_vm3, %v3545_v52  ;;  %v2282_v46 = vadd.f32 %v2281_v11, %v2280_v13  ;;  %v2851_v12 = vadd.f32 %v2850_v14, %v2849_v21  ;;  %2249 = vst.msk [vmem:[%s5139_s30 + $0x38] sm:$0xff] %vm634_vm3, %v2217_v60  ;;  %v2818_v0 = vmul.f32 %v3542_v42, %v3542_v42  ;;  %v2750_v18 = vsel %vm634_vm3, %v2601_v33, 0.0 }
 0x1eb   : > { %v2115_v8 = vpop.f32.mrf.mxu0  ;;  %v2614_v56 = vpop.f32.mrf.mxu1  ;;  %v2352_v50 = vmul.f32 %v2217_v60, %v2217_v60  ;;  %v2215_v17 = vadd.f32 %v2102_v43, %v5078_v23  ;;  %v2816_v6 = vmul.f32 %v2601_v33, %v2601_v33  ;;  %v2385_v28 = vadd.f32 %v2384_v9, %v2383_v40 }
 0x1ec   : > { %2717 = vst.msk [vmem:[%s5130_s8 + $0x40] sm:$0xff] %vm634_vm3, %v2614_v56  ;;  %v2754_v19 = vsel %vm634_vm3, %v3542_v42, 0.0  ;;  %v2751_v31 = vadd.f32 %v2750_v18, %v2749_v27  ;;  %v2220_v44 = vadd.f32 %v3511_v61, %v5080_v30  ;;  %v2287_v51 = vsel %vm634_vm3, %v2217_v60, 0.0 }
 0x1ed   : > { %v3512_v25 = vpop.f32.mrf.mxu0  ;;  %v5213_v48 = vpop.f32.mrf.mxu1  ;;  %2247 = vst.msk [vmem:[%s5139_s30 + $0x28] sm:$0xff] %vm634_vm3, %v2215_v17  ;;  %v2283_v23 = vsel %vm634_vm3, %v2215_v17, 0.0  ;;  %v2350_v4 = vmul.f32 %v2215_v17, %v2215_v17  ;;  %v2852_v1 = vsel %vm634_vm3, %v2816_v6, 0.0  ;;  %v2856_v42 = vsel %vm634_vm3, %v2818_v0, 0.0 }
 0x1ee   : > { %2720 = vst.msk [vmem:[%s5130_s8 + $0x58] sm:$0xff] %vm634_vm3, %v5213_v48  ;;  %v2284_v22 = vadd.f32 %v2283_v23, %v2282_v46  ;;  %v2753_v30 = vadd.f32 %v2752_v54, %v2751_v31  ;;  %v2853_v13 = vadd.f32 %v2852_v1, %v2851_v12  ;;  %2252 = vst.msk [vmem:[%s5139_s30 + $0x50] sm:$0xff] %vm634_vm3, %v2220_v44  ;;  %v2390_v57 = vsel %vm634_vm3, %v2352_v50, 0.0 }
 0x1ef   : > { %v2118_v43 = vpop.f32.mrf.mxu0  ;;  %v2617_v33 = vpop.f32.mrf.mxu1  ;;  %v2386_v58 = vsel %vm634_vm3, %v2350_v4, 0.0  ;;  %v2821_v2 = vmul.f32 %v3545_v52, %v3545_v52  ;;  %v2218_v40 = vadd.f32 %v2115_v8, %v5082_v15  ;;  %v2293_v14 = vsel %vm634_vm3, %v2220_v44, 0.0 }
 0x1f0   : > { %2718 = vst.msk [vmem:[%s5130_s8 + $0x48] sm:$0xff] %vm634_vm3, %v2617_v33  ;;  %v2286_v27 = vadd.f32 %v2285_v16, %v2284_v22  ;;  %v2387_v21 = vadd.f32 %v2386_v58, %v2385_v28  ;;  %v2855_v60 = vadd.f32 %v2854_v49, %v2853_v13  ;;  %v2755_v54 = vadd.f32 %v2754_v19, %v2753_v30 }
 0x1f1   : > { %v3515_v61 = vpop.f32.mrf.mxu0  ;;  %v5231_v11 = vpop.f32.mrf.mxu1  ;;  %v2355_v46 = vmul.f32 %v2220_v44, %v2220_v44  ;;  %v2760_v9 = vsel %vm634_vm3, %v3545_v52, 0.0  ;;  %2250 = vst.msk [vmem:[%s5139_s30 + $0x40] sm:$0xff] %vm634_vm3, %v2218_v40  ;;  %v2353_v12 = vmul.f32 %v2218_v40, %v2218_v40  ;;  %v2756_v49 = vsel %vm634_vm3, %v2614_v56, 0.0 }
 0x1f2   : > { %2723 = vst.msk [vmem:[%s5130_s8 + $0x70] sm:$0xff] %vm634_vm3, %v5231_v11  ;;  %v2389_v15 = vadd.f32 %v2388_v3, %v2387_v21  ;;  %v2288_v16 = vadd.f32 %v2287_v51, %v2286_v27  ;;  %v2819_v0 = vmul.f32 %v2614_v56, %v2614_v56  ;;  %v2289_v17 = vsel %vm634_vm3, %v2218_v40, 0.0 }
 0x1f3   : > { %v2131_v8 = vpop.f32.mrf.mxu0  ;;  %v5241_v50 = vpop.f32.mrf.mxu1  ;;  %v2757_v18 = vadd.f32 %v2756_v49, %v2755_v54  ;;  %v2857_v52 = vadd.f32 %v2856_v42, %v2855_v60  ;;  %v2221_v6 = vadd.f32 %v3512_v25, %v5084_v41  ;;  %v2862_v3 = vsel %vm634_vm3, %v2821_v2, 0.0 }
 0x1f4   : > { %2721 = vst.msk [vmem:[%s5130_s8 + $0x60] sm:$0xff] %vm634_vm3, %v5241_v50  ;;  %v2290_v28 = vadd.f32 %v2289_v17, %v2288_v16  ;;  %v2391_v19 = vadd.f32 %v2390_v57, %v2389_v15  ;;  %v2858_v56 = vsel %vm634_vm3, %v2819_v0, 0.0  ;;  %v2392_v51 = vsel %vm634_vm3, %v2353_v12, 0.0 }
 0x1f5   : > { %v3516_v31 = vpop.f32.mrf.mxu0  ;;  %v5250_v44 = vpop.f32.mrf.mxu1  ;;  %v2859_v23 = vadd.f32 %v2858_v56, %v2857_v52  ;;  %2253 = vst.msk [vmem:[%s5139_s30 + $0x58] sm:$0xff] %vm634_vm3, %v2221_v6  ;;  %v2822_v41 = vmul.f32 %v5213_v48, %v5213_v48  ;;  %v2219_v25 = vadd.f32 %v2118_v43, %v5086_v62  ;;  %v2356_v1 = vmul.f32 %v2221_v6, %v2221_v6 }
 0x1f6   : > { %2724 = vst.msk [vmem:[%s5130_s8 + $0x78] sm:$0xff] %vm634_vm3, %v5250_v44  ;;  %v2393_v4 = vadd.f32 %v2392_v51, %v2391_v19  ;;  %v2758_v42 = vsel %vm634_vm3, %v2617_v33, 0.0  ;;  %v2820_v22 = vmul.f32 %v2617_v33, %v2617_v33  ;;  %v2396_v57 = vsel %vm634_vm3, %v2355_v46, 0.0 }
 0x1f7   : > { %v2134_v30 = vpop.f32.mrf.mxu0  ;;  %v2633_v13 = vpop.f32.mrf.mxu1  ;;  %2251 = vst.msk [vmem:[%s5139_s30 + $0x48] sm:$0xff] %vm634_vm3, %v2219_v25  ;;  %v2291_v58 = vsel %vm634_vm3, %v2219_v25, 0.0  ;;  %v2354_v2 = vmul.f32 %v2219_v25, %v2219_v25  ;;  %v2759_v40 = vadd.f32 %v2758_v42, %v2757_v18  ;;  %v2762_v62 = vsel %vm634_vm3, %v5213_v48, 0.0 }
 0x1f8   : > { %2722 = vst.msk [vmem:[%s5130_s8 + $0x68] sm:$0xff] %vm634_vm3, %v2633_v13  ;;  %v2292_v43 = vadd.f32 %v2291_v58, %v2290_v28  ;;  %v2860_v33 = vsel %vm634_vm3, %v2820_v22, 0.0  ;;  %v2224_v27 = vadd.f32 %v3515_v61, %v5088_v7  ;;  %v2295_v54 = vsel %vm634_vm3, %v2221_v6, 0.0 }
 0x1f9   : > { %v3519_v21 = vpop.f32.mrf.mxu0  ;;  %v5272_v60 = vpop.f32.mrf.mxu1  ;;  %v2394_v46 = vsel %vm634_vm3, %v2354_v2, 0.0  ;;  %v2761_v12 = vadd.f32 %v2760_v9, %v2759_v40  ;;  %v2861_v15 = vadd.f32 %v2860_v33, %v2859_v23  ;;  %v2398_v48 = vsel %vm634_vm3, %v2356_v1, 0.0 }
 0x1fa   : > { %2727 = vst.msk [vmem:[%s5130_s8 + $0x90] sm:$0xff] %vm634_vm3, %v5272_v60  ;;  %v2864_v16 = vsel %vm634_vm3, %v2822_v41, 0.0  ;;  %v2294_v49 = vadd.f32 %v2293_v14, %v2292_v43  ;;  %v2395_v7 = vadd.f32 %v2394_v46, %v2393_v4  ;;  %2256 = vst.msk [vmem:[%s5139_s30 + $0x70] sm:$0xff] %vm634_vm3, %v2224_v27  ;;  %v2825_v9 = vmul.f32 %v5231_v11, %v5231_v11 }
 0x1fb   : > { %v5283_v61 = vpop.f32.mrf.mxu0  ;;  %v5285_v0 = vpop.f32.mrf.mxu1  ;;  %v2863_v17 = vadd.f32 %v2862_v3, %v2861_v15  ;;  %v2222_v18 = vadd.f32 %v2131_v8, %v5090_v32  ;;  %v2763_v52 = vadd.f32 %v2762_v62, %v2761_v12  ;;  %v2359_v6 = vmul.f32 %v2224_v27, %v2224_v27 }
 0x1fc   : > { %2725 = vst.msk [vmem:[%s5130_s8 + $0x80] sm:$0xff] %vm634_vm3, %v5285_v0  ;;  %v2397_v14 = vadd.f32 %v2396_v57, %v2395_v7  ;;  %v2296_v28 = vadd.f32 %v2295_v54, %v2294_v49  ;;  %v2764_v19 = vsel %vm634_vm3, %v5241_v50, 0.0  ;;  %v2823_v23 = vmul.f32 %v5241_v50, %v5241_v50 }
 0x1fd   : > { %v5295_v56 = vpop.f32.mrf.mxu0  ;;  %v5297_v51 = vpop.f32.mrf.mxu1  ;;  %2254 = vst.msk [vmem:[%s5139_s30 + $0x60] sm:$0xff] %vm634_vm3, %v2222_v18  ;;  %v2297_v3 = vsel %vm634_vm3, %v2222_v18, 0.0  ;;  %v2357_v32 = vmul.f32 %v2222_v18, %v2222_v18  ;;  %v2765_v8 = vadd.f32 %v2764_v19, %v2763_v52  ;;  %v2865_v4 = vadd.f32 %v2864_v16, %v2863_v17 }
 0x1fe   : > { %2728 = vst.msk [vmem:[%s5130_s8 + $0x98] sm:$0xff] %vm634_vm3, %v5297_v51  ;;  %v2298_v41 = vadd.f32 %v2297_v3, %v2296_v28  ;;  %v2399_v25 = vadd.f32 %v2398_v48, %v2397_v14  ;;  %v2225_v1 = vadd.f32 %v3516_v31, %v5092_v34  ;;  %v2301_v57 = vsel %vm634_vm3, %v2224_v27, 0.0 }
 0x1ff   : > { %v5308_v42 = vpop.f32.mrf.mxu0  ;;  %v5310_v22 = vpop.f32.mrf.mxu1  ;;  %v2768_v58 = vsel %vm634_vm3, %v5231_v11, 0.0  ;;  %v2400_v50 = vsel %vm634_vm3, %v2357_v32, 0.0  ;;  %v2866_v2 = vsel %vm634_vm3, %v2823_v23, 0.0  ;;  %v2870_v40 = vsel %vm634_vm3, %v2825_v9, 0.0 }
 0x200   : > { %2726 = vst.msk [vmem:[%s5130_s8 + $0x88] sm:$0xff] %vm634_vm3, %v5310_v22  ;;  %v2401_v34 = vadd.f32 %v2400_v50, %v2399_v25  ;;  %v2867_v31 = vadd.f32 %v2866_v2, %v2865_v4  ;;  %2257 = vst.msk [vmem:[%s5139_s30 + $0x78] sm:$0xff] %vm634_vm3, %v2225_v1  ;;  %v2826_v62 = vmul.f32 %v5250_v44, %v5250_v44  ;;  %v2766_v54 = vsel %vm634_vm3, %v2633_v13, 0.0 }
 0x201   : > { %v5325_v43 = vpop.f32.mrf.mxu0  ;;  %v5327_v11 = vpop.f32.mrf.mxu1  ;;  %v2360_v33 = vmul.f32 %v2225_v1, %v2225_v1  ;;  %v2223_v27 = vadd.f32 %v2134_v30, %v5094_v39  ;;  %v2824_v46 = vmul.f32 %v2633_v13, %v2633_v13  ;;  %v2404_v12 = vsel %vm634_vm3, %v2359_v6, 0.0 }
 0x202   : > { %2731 = vst.msk [vmem:[%s5130_s8 + $0xb0] sm:$0xff] %vm634_vm3, %v5327_v11  ;;  %v2770_v15 = vsel %vm634_vm3, %v5250_v44, 0.0  ;;  %v2767_v48 = vadd.f32 %v2766_v54, %v2765_v8  ;;  %v2228_v16 = vadd.f32 %v3519_v21, %v5096_v63  ;;  %v2303_v39 = vsel %vm634_vm3, %v2225_v1, 0.0 }
 0x203   : > { %v5338_v49 = vpop.f32.mrf.mxu0  ;;  %v5340_v7 = vpop.f32.mrf.mxu1  ;;  %2255 = vst.msk [vmem:[%s5139_s30 + $0x68] sm:$0xff] %vm634_vm3, %v2223_v27  ;;  %v2299_v30 = vsel %vm634_vm3, %v2223_v27, 0.0  ;;  %v2358_v13 = vmul.f32 %v2223_v27, %v2223_v27  ;;  %v2868_v17 = vsel %vm634_vm3, %v2824_v46, 0.0  ;;  %v2872_v44 = vsel %vm634_vm3, %v2826_v62, 0.0 }
 0x204   : > { %2729 = vst.msk [vmem:[%s5130_s8 + $0xa0] sm:$0xff] %vm634_vm3, %v5340_v7  ;;  %v2300_v63 = vadd.f32 %v2299_v30, %v2298_v41  ;;  %v2769_v21 = vadd.f32 %v2768_v58, %v2767_v48  ;;  %v2869_v9 = vadd.f32 %v2868_v17, %v2867_v31  ;;  %2260 = vst.msk [vmem:[%s5139_s30 + $0x90] sm:$0xff] %vm634_vm3, %v2228_v16  ;;  %v2406_v52 = vsel %vm634_vm3, %v2360_v33, 0.0 }
 0x205   : > { %v5353_v18 = vpop.f32.mrf.mxu1  ;;  %v2402_v14 = vsel %vm634_vm3, %v2358_v13, 0.0  ;;  %v2829_v6 = vmul.f32 %v5272_v60, %v5272_v60  ;;  %v2226_v28 = vadd.f32 %v5283_v61, %v5098_v5  ;;  %v5364_v23 = vpop.f32.mrf.mxu0  ;;  %v2309_v25 = vsel %vm634_vm3, %v2228_v16, 0.0 }
 0x206   : > { %2732 = vst.msk [vmem:[%s5130_s8 + $0xb8] sm:$0xff] %vm634_vm3, %v5353_v18  ;;  %v2302_v19 = vadd.f32 %v2301_v57, %v2300_v63  ;;  %v2403_v3 = vadd.f32 %v2402_v14, %v2401_v34  ;;  %v2871_v32 = vadd.f32 %v2870_v40, %v2869_v9  ;;  %v2771_v8 = vadd.f32 %v2770_v15, %v2769_v21 }
 0x207   : > { %v5366_v41 = vpop.f32.mrf.mxu1  ;;  %v2363_v4 = vmul.f32 %v2228_v16, %v2228_v16  ;;  %v2776_v1 = vsel %vm634_vm3, %v5272_v60, 0.0  ;;  %2258 = vst.msk [vmem:[%s5139_s30 + $0x80] sm:$0xff] %vm634_vm3, %v2226_v28  ;;  %v2361_v5 = vmul.f32 %v2226_v28, %v2226_v28  ;;  %v2772_v58 = vsel %vm634_vm3, %v5285_v0, 0.0  ;;  %v5390_v54 = vpop.f32.mrf.mxu0 }
 0x208   : > { %2730 = vst.msk [vmem:[%s5130_s8 + $0xa8] sm:$0xff] %vm634_vm3, %v5366_v41  ;;  %v2405_v61 = vadd.f32 %v2404_v12, %v2403_v3  ;;  %v2304_v57 = vadd.f32 %v2303_v39, %v2302_v19  ;;  %v2827_v50 = vmul.f32 %v5285_v0, %v5285_v0  ;;  %v2305_v40 = vsel %vm634_vm3, %v2226_v28, 0.0 }
 0x209   : > { %v5380_v2 = vpop.f32.mrf.mxu1  ;;  %v2773_v60 = vadd.f32 %v2772_v58, %v2771_v8  ;;  %v2873_v34 = vadd.f32 %v2872_v44, %v2871_v32  ;;  %v2229_v31 = vadd.f32 %v5295_v56, %v5100_v47  ;;  %v2878_v62 = vsel %vm634_vm3, %v2829_v6, 0.0 }
 0x20a   : > { %2735 = vst.msk [vmem:[%s5130_s8 + $0xd0] sm:$0xff] %vm634_vm3, %v5380_v2  ;;  %v2306_v33 = vadd.f32 %v2305_v40, %v2304_v57  ;;  %v2407_v27 = vadd.f32 %v2406_v52, %v2405_v61  ;;  %v2874_v0 = vsel %vm634_vm3, %v2827_v50, 0.0  ;;  %v2408_v12 = vsel %vm634_vm3, %v2361_v5, 0.0  ;;  %v3527_v52 = vpop.f32.mrf.mxu0 }
 0x20b   : > { %v5392_v46 = vpop.f32.mrf.mxu1  ;;  %v2875_v15 = vadd.f32 %v2874_v0, %v2873_v34  ;;  %2261 = vst.msk [vmem:[%s5139_s30 + $0x98] sm:$0xff] %vm634_vm3, %v2229_v31  ;;  %v2830_v47 = vmul.f32 %v5297_v51, %v5297_v51  ;;  %v2227_v56 = vadd.f32 %v5308_v42, %v5102_v24  ;;  %v2364_v16 = vmul.f32 %v2229_v31, %v2229_v31 }
 0x20c   : > { %2733 = vst.msk [vmem:[%s5130_s8 + $0xc0] sm:$0xff] %vm634_vm3, %v5392_v46  ;;  %v2409_v48 = vadd.f32 %v2408_v12, %v2407_v27  ;;  %v2774_v39 = vsel %vm634_vm3, %v5310_v22, 0.0  ;;  %v2828_v30 = vmul.f32 %v5310_v22, %v5310_v22  ;;  %v2412_v17 = vsel %vm634_vm3, %v2363_v4, 0.0  ;;  %v2179_v40 = vpop.f32.mrf.mxu0 }
 0x20d   : > { %v5408_v13 = vpop.f32.mrf.mxu1  ;;  %2259 = vst.msk [vmem:[%s5139_s30 + $0x88] sm:$0xff] %vm634_vm3, %v2227_v56  ;;  %v2307_v24 = vsel %vm634_vm3, %v2227_v56, 0.0  ;;  %v2362_v42 = vmul.f32 %v2227_v56, %v2227_v56  ;;  %v2775_v44 = vadd.f32 %v2774_v39, %v2773_v60  ;;  %v2778_v63 = vsel %vm634_vm3, %v5297_v51, 0.0 }
 0x20e   : > { %2736 = vst.msk [vmem:[%s5130_s8 + $0xd8] sm:$0xff] %vm634_vm3, %v5408_v13  ;;  %v2308_v21 = vadd.f32 %v2307_v24, %v2306_v33  ;;  %v2876_v22 = vsel %vm634_vm3, %v2828_v30, 0.0  ;;  %v2232_v9 = vadd.f32 %v5325_v43, %v5104_v38  ;;  %v2311_v6 = vsel %vm634_vm3, %v2229_v31, 0.0 }
 0x20f   : > { %v5422_v14 = vpop.f32.mrf.mxu1  ;;  %v2410_v28 = vsel %vm634_vm3, %v2362_v42, 0.0  ;;  %v2777_v19 = vadd.f32 %v2776_v1, %v2775_v44  ;;  %v2877_v3 = vadd.f32 %v2876_v22, %v2875_v15  ;;  %v2414_v51 = vsel %vm634_vm3, %v2364_v16, 0.0 }
 0x210   : > { %2734 = vst.msk [vmem:[%s5130_s8 + $0xc8] sm:$0xff] %vm634_vm3, %v5422_v14  ;;  %v2880_v32 = vsel %vm634_vm3, %v2830_v47, 0.0  ;;  %v2310_v8 = vadd.f32 %v2309_v25, %v2308_v21  ;;  %v2411_v38 = vadd.f32 %v2410_v28, %v2409_v48  ;;  %2264 = vst.msk [vmem:[%s5139_s30 + $0xb0] sm:$0xff] %vm634_vm3, %v2232_v9  ;;  %v2833_v1 = vmul.f32 %v5327_v11, %v5327_v11 }
 0x211   : > { %v5433_v43 = vpop.f32.mrf.mxu1  ;;  %v2879_v4 = vadd.f32 %v2878_v62, %v2877_v3  ;;  %v2230_v5 = vadd.f32 %v5338_v49, %v5106_v35  ;;  %v2779_v61 = vadd.f32 %v2778_v63, %v2777_v19  ;;  %v2367_v58 = vmul.f32 %v2232_v9, %v2232_v9 }
 0x212   : > { %2739 = vst.msk [vmem:[%s5130_s8 + $0xf0] sm:$0xff] %vm634_vm3, %v5433_v43  ;;  %v2413_v57 = vadd.f32 %v2412_v17, %v2411_v38  ;;  %v2312_v25 = vadd.f32 %v2311_v6, %v2310_v8  ;;  %v2780_v50 = vsel %vm634_vm3, %v5340_v7, 0.0  ;;  %v2831_v49 = vmul.f32 %v5340_v7, %v5340_v7 }
 0x213   : > { %v5444_v60 = vpop.f32.mrf.mxu1  ;;  %2262 = vst.msk [vmem:[%s5139_s30 + $0xa0] sm:$0xff] %vm634_vm3, %v2230_v5  ;;  %v2313_v34 = vsel %vm634_vm3, %v2230_v5, 0.0  ;;  %v2365_v31 = vmul.f32 %v2230_v5, %v2230_v5  ;;  %v2781_v35 = vadd.f32 %v2780_v50, %v2779_v61  ;;  %v2881_v27 = vadd.f32 %v2880_v32, %v2879_v4 }
 0x214   : > { %2737 = vst.msk [vmem:[%s5130_s8 + $0xe0] sm:$0xff] %vm634_vm3, %v5444_v60  ;;  %v2314_v62 = vadd.f32 %v2313_v34, %v2312_v25  ;;  %v2415_v33 = vadd.f32 %v2414_v51, %v2413_v57  ;;  %v2233_v0 = vadd.f32 %v5364_v23, %v5108_v20  ;;  %v2882_v47 = vsel %vm634_vm3, %v2831_v49, 0.0  ;;  %v3528_v20 = vpop.f32.mrf.mxu0 }
 0x215   : > { %v5456_v12 = vpop.f32.mrf.mxu1  ;;  %v2416_v15 = vsel %vm634_vm3, %v2365_v31, 0.0  ;;  %v2317_v7 = vsel %vm634_vm3, %v2232_v9, 0.0  ;;  %v2784_v56 = vsel %vm634_vm3, %v5327_v11, 0.0  ;;  %v2883_v16 = vadd.f32 %v2882_v47, %v2881_v27 }
 0x216   : > { %2740 = vst.msk [vmem:[%s5130_s8 + $0xf8] sm:$0xff] %vm634_vm3, %v5456_v12  ;;  %v2417_v48 = vadd.f32 %v2416_v15, %v2415_v33  ;;  %2265 = vst.msk [vmem:[%s5139_s30 + $0xb8] sm:$0xff] %vm634_vm3, %v2233_v0  ;;  %v2834_v39 = vmul.f32 %v5353_v18, %v5353_v18  ;;  %v2231_v30 = vadd.f32 %v5390_v54, %v5110_v45  ;;  %v2782_v17 = vsel %vm634_vm3, %v5366_v41, 0.0  ;;  %v2182_v19 = vpop.f32.mrf.mxu0 }
 0x217   : > { %v5468_v23 = vpop.f32.mrf.mxu1  ;;  %v2832_v11 = vmul.f32 %v5366_v41, %v5366_v41  ;;  %v2420_v24 = vsel %vm634_vm3, %v2367_v58, 0.0  ;;  %v2886_v42 = vsel %vm634_vm3, %v2833_v1, 0.0  ;;  %v2783_v44 = vadd.f32 %v2782_v17, %v2781_v35 }
 0x218   : > { %2738 = vst.msk [vmem:[%s5130_s8 + $0xe8] sm:$0xff] %vm634_vm3, %v5468_v23  ;;  %v2236_v63 = vadd.f32 %v3527_v52, %v5112_v29  ;;  %v2368_v21 = vmul.f32 %v2233_v0, %v2233_v0  ;;  %2263 = vst.msk [vmem:[%s5139_s30 + $0xa8] sm:$0xff] %vm634_vm3, %v2231_v30  ;;  %v2315_v45 = vsel %vm634_vm3, %v2231_v30, 0.0  ;;  %v2366_v54 = vmul.f32 %v2231_v30, %v2231_v30  ;;  %v3531_v50 = vpop.f32.mrf.mxu0 }
 0x219   : > { %v2884_v22 = vsel %vm634_vm3, %v2832_v11, 0.0  ;;  %v2786_v41 = vsel %vm634_vm3, %v5353_v18, 0.0  ;;  %v2316_v9 = vadd.f32 %v2315_v45, %v2314_v62  ;;  %v2785_v6 = vadd.f32 %v2784_v56, %v2783_v44 }
 0x21a   : > { %v2885_v28 = vadd.f32 %v2884_v22, %v2883_v16  ;;  %2268 = vst.msk [vmem:[%s5139_s30 + $0xd0] sm:$0xff] %vm634_vm3, %v2236_v63  ;;  %v2319_v29 = vsel %vm634_vm3, %v2233_v0, 0.0  ;;  %v2888_v52 = vsel %vm634_vm3, %v2834_v39, 0.0  ;;  %v2418_v3 = vsel %vm634_vm3, %v2366_v54, 0.0 }
 0x21b   : > { %v2234_v51 = vadd.f32 %v2179_v40, %v5114_v36  ;;  %v2318_v32 = vadd.f32 %v2317_v7, %v2316_v9  ;;  %v2419_v8 = vadd.f32 %v2418_v3, %v2417_v48  ;;  %v2787_v4 = vadd.f32 %v2786_v41, %v2785_v6  ;;  %v2195_v48 = vpop.f32.mrf.mxu0 }
 0x21c   : > { %v2887_v38 = vadd.f32 %v2886_v42, %v2885_v28  ;;  %v2422_v18 = vsel %vm634_vm3, %v2368_v21, 0.0  ;;  %v2792_v1 = vsel %vm634_vm3, %v5380_v2, 0.0  ;;  %v2837_v5 = vmul.f32 %v5380_v2, %v5380_v2 }
 0x21d   : > { %2266 = vst.msk [vmem:[%s5139_s30 + $0xc0] sm:$0xff] %vm634_vm3, %v2234_v51  ;;  %v2369_v61 = vmul.f32 %v2234_v51, %v2234_v51  ;;  %v2421_v57 = vadd.f32 %v2420_v24, %v2419_v8  ;;  %v2320_v58 = vadd.f32 %v2319_v29, %v2318_v32  ;;  %v2788_v36 = vsel %vm634_vm3, %v5392_v46, 0.0  ;;  %v3532_v41 = vpop.f32.mrf.mxu0 }
 0x21e   : > { %v2835_v25 = vmul.f32 %v5392_v46, %v5392_v46  ;;  %v2321_v40 = vsel %vm634_vm3, %v2234_v51, 0.0  ;;  %v2789_v34 = vadd.f32 %v2788_v36, %v2787_v4  ;;  %v2889_v31 = vadd.f32 %v2888_v52, %v2887_v38 }
 0x21f   : > { %v2237_v35 = vadd.f32 %v3528_v20, %v5116_v37  ;;  %v2325_v2 = vsel %vm634_vm3, %v2236_v63, 0.0  ;;  %v2322_v49 = vadd.f32 %v2321_v40, %v2320_v58  ;;  %v2423_v62 = vadd.f32 %v2422_v18, %v2421_v57 }
 0x220   : > { %v2890_v33 = vsel %vm634_vm3, %v2835_v25, 0.0  ;;  %v2371_v27 = vmul.f32 %v2236_v63, %v2236_v63  ;;  %v2424_v0 = vsel %vm634_vm3, %v2369_v61, 0.0  ;;  %v2235_v46 = vadd.f32 %v2182_v19, %v5118_v55 }
 0x221   : > { %v2891_v15 = vadd.f32 %v2890_v33, %v2889_v31  ;;  %2269 = vst.msk [vmem:[%s5139_s30 + $0xd8] sm:$0xff] %vm634_vm3, %v2237_v35  ;;  %v2894_v47 = vsel %vm634_vm3, %v2837_v5, 0.0  ;;  %v2425_v7 = vadd.f32 %v2424_v0, %v2423_v62  ;;  %v2790_v37 = vsel %vm634_vm3, %v5422_v14, 0.0 }
 0x222   : > { %v2836_v56 = vmul.f32 %v5422_v14, %v5422_v14  ;;  %v2838_v16 = vmul.f32 %v5408_v13, %v5408_v13  ;;  %2267 = vst.msk [vmem:[%s5139_s30 + $0xc8] sm:$0xff] %vm634_vm3, %v2235_v46  ;;  %v2323_v20 = vsel %vm634_vm3, %v2235_v46, 0.0  ;;  %v2370_v39 = vmul.f32 %v2235_v46, %v2235_v46 }
 0x223   : > { %v2791_v55 = vadd.f32 %v2790_v37, %v2789_v34  ;;  %v2372_v30 = vmul.f32 %v2237_v35, %v2237_v35  ;;  %v2324_v17 = vadd.f32 %v2323_v20, %v2322_v49  ;;  %v2240_v24 = vadd.f32 %v3531_v50, %v5120_v26 }
 0x224   : > { %v2892_v11 = vsel %vm634_vm3, %v2836_v56, 0.0  ;;  %v2428_v42 = vsel %vm634_vm3, %v2371_v27, 0.0  ;;  %v2426_v14 = vsel %vm634_vm3, %v2370_v39, 0.0  ;;  %v2327_v21 = vsel %vm634_vm3, %v2237_v35, 0.0 }
 0x225   : > { %v2793_v44 = vadd.f32 %v2792_v1, %v2791_v55  ;;  %v2893_v63 = vadd.f32 %v2892_v11, %v2891_v15  ;;  %v2794_v45 = vsel %vm634_vm3, %v5408_v13, 0.0  ;;  %v2326_v54 = vadd.f32 %v2325_v2, %v2324_v17  ;;  %2272 = vst.msk [vmem:[%s5139_s30 + $0xf0] sm:$0xff] %vm634_vm3, %v2240_v24  ;;  %v2198_v1 = vpop.f32.mrf.mxu0 }
 0x226   : > { %v2427_v22 = vadd.f32 %v2426_v14, %v2425_v7  ;;  %v2896_v9 = vsel %vm634_vm3, %v2838_v16, 0.0  ;;  %v2238_v6 = vadd.f32 %v2195_v48, %v5122_v53  ;;  %v2430_v19 = vsel %vm634_vm3, %v2372_v30, 0.0 }
 0x227   : > { %v2895_v26 = vadd.f32 %v2894_v47, %v2893_v63  ;;  %v2795_v28 = vadd.f32 %v2794_v45, %v2793_v44  ;;  %v2328_v52 = vadd.f32 %v2327_v21, %v2326_v54  ;;  %v2796_v3 = vsel %vm634_vm3, %v5444_v60, 0.0 }
 0x228   : > { %v2429_v29 = vadd.f32 %v2428_v42, %v2427_v22  ;;  %2270 = vst.msk [vmem:[%s5139_s30 + $0xe0] sm:$0xff] %vm634_vm3, %v2238_v6  ;;  %v2329_v13 = vsel %vm634_vm3, %v2238_v6, 0.0  ;;  %v2373_v51 = vmul.f32 %v2238_v6, %v2238_v6  ;;  %v2839_v8 = vmul.f32 %v5444_v60, %v5444_v60 }
 0x229   : > { %v2797_v32 = vadd.f32 %v2796_v3, %v2795_v28  ;;  %v2330_v38 = vadd.f32 %v2329_v13, %v2328_v52  ;;  %v2897_v4 = vadd.f32 %v2896_v9, %v2895_v26  ;;  %v2241_v18 = vadd.f32 %v3532_v41, %v5125_v59 }
 0x22a   : > { %v2431_v53 = vadd.f32 %v2430_v19, %v2429_v29  ;;  %v2432_v5 = vsel %vm634_vm3, %v2373_v51, 0.0  ;;  %v2898_v61 = vsel %vm634_vm3, %v2839_v8, 0.0  ;;  %v2841_v36 = vmul.f32 %v5433_v43, %v5433_v43 }
 0x22b   : > { %v2899_v58 = vadd.f32 %v2898_v61, %v2897_v4  ;;  %2273 = vst.msk [vmem:[%s5139_s30 + $0xf8] sm:$0xff] %vm634_vm3, %v2241_v18  ;;  %v2239_v60 = vadd.f32 %v2198_v1, %v5134_v10  ;;  %v2798_v25 = vsel %vm634_vm3, %v5468_v23, 0.0  ;;  %v2840_v59 = vmul.f32 %v5468_v23, %v5468_v23 }
 0x22c   : > { %v2433_v57 = vadd.f32 %v2432_v5, %v2431_v53  ;;  %v2375_v50 = vmul.f32 %v2240_v24, %v2240_v24  ;;  %v2800_v40 = vsel %vm634_vm3, %v5433_v43, 0.0  ;;  %v2799_v34 = vadd.f32 %v2798_v25, %v2797_v32 }
 0x22d   : > { %v2842_v31 = vmul.f32 %v5456_v12, %v5456_v12  ;;  %2271 = vst.msk [vmem:[%s5139_s30 + $0xe8] sm:$0xff] %vm634_vm3, %v2239_v60  ;;  %v2331_v35 = vsel %vm634_vm3, %v2239_v60, 0.0  ;;  %v2374_v2 = vmul.f32 %v2239_v60, %v2239_v60  ;;  %v2900_v10 = vsel %vm634_vm3, %v2840_v59, 0.0 }
 0x22e   : > { %v2333_v49 = vsel %vm634_vm3, %v2240_v24, 0.0  ;;  %v2332_v62 = vadd.f32 %v2331_v35, %v2330_v38  ;;  %v2801_v33 = vadd.f32 %v2800_v40, %v2799_v34  ;;  %v2901_v23 = vadd.f32 %v2900_v10, %v2899_v58 }
 0x22f   : > { %v2902_v27 = vsel %vm634_vm3, %v2841_v36, 0.0  ;;  %v2376_v0 = vmul.f32 %v2241_v18, %v2241_v18  ;;  %v2802_v43 = vsel %vm634_vm3, %v5456_v12, 0.0  ;;  %v2434_v15 = vsel %vm634_vm3, %v2374_v2, 0.0 }
 0x230   : > { %v2334_v46 = vadd.f32 %v2333_v49, %v2332_v62  ;;  %v2435_v47 = vadd.f32 %v2434_v15, %v2433_v57  ;;  %v2803_v7 = vadd.f32 %v2802_v43, %v2801_v33  ;;  %v2903_v37 = vadd.f32 %v2902_v27, %v2901_v23 }
 0x231   : > { %v2436_v56 = vsel %vm634_vm3, %v2375_v50, 0.0  ;;  %v2335_v48 = vsel %vm634_vm3, %v2241_v18, 0.0  ;;  %v2904_v16 = vsel %vm634_vm3, %v2842_v31, 0.0  ;;  %v2438_v12 = vsel %vm634_vm3, %v2376_v0, 0.0 }
 0x232   : > { %v2336_v20 = vadd.f32 %v2335_v48, %v2334_v46  ;;  %v2437_v39 = vadd.f32 %v2436_v56, %v2435_v47  ;;  %v2804_v55 = vrot.slane %v2803_v7, 4  ;;  %v2905_v30 = vadd.f32 %v2904_v16, %v2903_v37 }
 0x234   : > { %v2337_v17 = vrot.slane %v2336_v20, 4  ;;  %v2439_v11 = vadd.f32 %v2438_v12, %v2437_v39  ;;  %v2805_v24 = vadd.f32 %v2804_v55, %v2803_v7  ;;  %v2906_v42 = vrot.slane %v2905_v30, 4 }
 0x236   : > { %v2338_v14 = vadd.f32 %v2337_v17, %v2336_v20  ;;  %v2440_v44 = vrot.slane %v2439_v11, 4  ;;  %v2806_v63 = vrot.slane %v2805_v24, 2  ;;  %v2907_v21 = vadd.f32 %v2906_v42, %v2905_v30 }
 0x238   : > { %v2339_v45 = vrot.slane %v2338_v14, 2  ;;  %v2441_v54 = vadd.f32 %v2440_v44, %v2439_v11  ;;  %v2807_v22 = vadd.f32 %v2806_v63, %v2805_v24  ;;  %v2908_v41 = vrot.slane %v2907_v21, 2 }
 0x23a   : > { %v2340_v9 = vadd.f32 %v2339_v45, %v2338_v14  ;;  %v2442_v26 = vrot.slane %v2441_v54, 2  ;;  %v2808_v6 = vrot.slane %v2807_v22, 1  ;;  %v2909_v28 = vadd.f32 %v2908_v41, %v2907_v21 }
 0x23c   : > { %v2341_v19 = vrot.slane %v2340_v9, 1  ;;  %v2443_v29 = vadd.f32 %v2442_v26, %v2441_v54  ;;  %v2809_v52 = vadd.f32 %v2808_v6, %v2807_v22  ;;  %v2910_v3 = vrot.slane %v2909_v28, 1 }
 0x23e   : > { %v2342_v13 = vadd.f32 %v2341_v19, %v2340_v9  ;;  %v2444_v51 = vrot.slane %v2443_v29, 1  ;;  %v2911_v32 = vadd.f32 %v2910_v3, %v2909_v28  ;;  %2810 = vst.msk [vmem:[%s232_s14 + $0x2] sm:$0x1] %vm2343_vm5, %v2809_v52 }
 0x240   : > { %2344 = vst.msk [vmem:[%s232_s14] sm:$0x1] %vm2343_vm5, %v2342_v13  ;;  %v2445_v8 = vadd.f32 %v2444_v51, %v2443_v29  ;;  %2912 = vst.msk [vmem:[%s232_s14 + $0x3] sm:$0x1] %vm2343_vm5, %v2911_v32 }
 0x242   : > { %2446 = vst.msk [vmem:[%s232_s14 + $0x1] sm:$0x1] %vm2343_vm5, %v2445_v8 }
 0x243   : > { %4109 = shalt.err (!%p4106_p3)
}
 0x244   : > { %s4110_s8 = scalar_lea.hbm %s2941_s23, 64  ;;  %s4114_s30 = scalar_lea.hbm %s5620_s5, 128 }
 0x245   : > { %p4111_p4 = scmp.ne.s32.totalorder %s2941_s23, %s4110_s8  ;;  %p4115_p9 = scmp.lt.s32.totalorder %s2941_s23, %s5620_s5 }
 0x246   : > { %p4116_p10 = scmp.lt.s32.totalorder %s4114_s30, %s4110_s8 }
 0x247   : > { %p4112_p7 = pnand %p4111_p4, %p4229_p5 }
 0x248   : > { %p4117_p11 = por %p4116_p10, %p4115_p9 }
 0x249   : > { %p4113_p8 = pneg %p4112_p7 }
 0x24b   : > { %p4118_p12 = pnand %p4117_p11, %p4113_p8 }
 0x24d   : > { %4121 = shalt.err (!%p4118_p12)
}
 0x24e   : > { %3572 = dma.vmem_to_hbm [thread:$0]  (%p4229_p5), %s2944_s15, 64, %s2941_s23, %s2924_s22  }
 0x24f PF: > { %p3578_p13 = scmp.ge.s32.totalorder %s4156_s21, 2  ;;  %s2971_s13 = sand.u32 1, %s4144_s18  }
 0x250   : > { %s2972_s14 = scalar_lea.sflag [#allocation3], %s2971_s13 }
 0x251   : > { %p3575_p0 = pnand %p3578_p13, %p4233_p6 }
 0x253   : > { %p3576_p1 = pneg %p3575_p0 }
 0x255   : > { %4139 = dma.done.wait (%p3576_p1), %s2972_s14, 64  }
 0x256   : > { %4141 = vsyncadd (%p3576_p1), %s2972_s14, 4294967232  ;;  %p16_p2 = scmp.ge.s32.totalorder %s4216_s24, 4   ;;  %s5623_s18 = smov %s4148_s19 }
 0x257   : > { %s5624_s19 = smov %s4152_s20  ;;  %s5625_s20 = smov %s4227_s27 }
 0x258   : > { %s5626_s21 = smov %s4216_s24  ;;  %18 = sbr.rel (!%p16_p2) target bundleno = 3 (0x3), region = 95 }
 0x25d   :  { %2977 = vsyncpa [#allocation3], 1 }
 0x25e   :  { %2979 = vsyncpa [#allocation3 + $0x1], 1 }

</bundles_post_ra>
